<compile_context>
chip_gen: v7x
topology: tpu7x:2x2x1
jax: 0.10.0
libtpu: 0.0.40
codegen_flags: <defaults>
</compile_context>

<pallas_src>
import functools

import jax
import jax.numpy as jnp
from jax import lax
from jax.experimental import pallas as pl
from jax.experimental.pallas import tpu as pltpu

# Op ids — the subset of composer's augmentation_sets["all"] with a clean
# dense-tensor equivalent.
OP_IDENTITY = 0
OP_SOLARIZE = 1
OP_POSTERIZE = 2
OP_BRIGHTNESS = 3
OP_CONTRAST = 4
OP_AUTOCONTRAST = 5
OP_TRANSLATE_X = 6
OP_TRANSLATE_Y = 7
NUM_OPS = 8


def _apply_one_aug(x, op, mag, col, row, *, c, h, w):
    """Apply the augmentation selected by scalar `op` to x: (C, H*W) f32.

    `col` / `row` are int32 (1, H*W) index maps (flat index -> column / row),
    precomputed in the wrapper so no in-kernel integer div/mod is needed.
    """
    hw = h * w

    def _identity(x, mag):
        return x

    def _solarize(x, mag):
        # ImageOps.solarize: invert pixels >= threshold (mag = threshold).
        return jnp.where(x < mag, x, 255.0 - x)

    def _posterize(x, mag):
        # Quantize to step q = 2**(8 - bits) (mag = q); composer uses 0..4 bits.
        q = jnp.maximum(mag, 1.0)
        return jnp.floor(x / q) * q

    def _brightness(x, mag):
        # ImageEnhance.Brightness: blend towards black (mag = factor).
        return jnp.clip(x * mag, 0.0, 255.0)

    def _contrast(x, mag):
        # ImageEnhance.Contrast: blend towards the rounded mean of the
        # truncated-integer L (luma) channel, like PIL.
        if c >= 3:
            lum = jnp.floor(0.299 * x[0:1] + 0.587 * x[1:2] + 0.114 * x[2:3])
        else:
            lum = jnp.floor(x[0:1])
        mean = jnp.floor(jnp.mean(lum, keepdims=True) + 0.5)
        return jnp.clip((x - mean) * mag + mean, 0.0, 255.0)

    def _autocontrast(x, mag):
        # Per-channel rescale: min -> 0, max -> 255 (exact divide; tiny (c,1)).
        cmin = jnp.min(x, axis=1, keepdims=True)
        cmax = jnp.max(x, axis=1, keepdims=True)
        scale = 255.0 / jnp.maximum(cmax - cmin, 1e-6)
        return jnp.where(cmax > cmin, (x - cmin) * scale, x)

    def _shifted(x, s, valid):
        # Shift the flattened lane axis by s (zero fill where `valid` is false).
        # pltpu.roll lives in the XLU slot, the mask in the VPU slot.
        s = jnp.where(s < 0, s + hw, s)            # non-negative rotate amount
        rolled = pltpu.roll(x, s, axis=1)
        return jnp.where(valid, rolled, 0.0)

    def _translate_x(x, mag):
        # Integer shift along W, zero fill (PIL AFFINE default fill).
        k = mag.astype(jnp.int32)
        valid = jnp.logical_and(col - k >= 0, col - k < w)
        return _shifted(x, k, valid)

    def _translate_y(x, mag):
        # Integer shift along H, zero fill.
        k = mag.astype(jnp.int32)
        valid = jnp.logical_and(row - k >= 0, row - k < h)
        return _shifted(x, k * w, valid)

    return lax.switch(
        op,
        [_identity, _solarize, _posterize, _brightness,
         _contrast, _autocontrast, _translate_x, _translate_y],
        x, mag)


def randaugment_kernel(ops_ref, mags_ref, colrow_ref, img_ref, out_ref,
                       *, depth, b_tile, c, h, w):
    """b_tile images per grid step; flat schedule tables live in SMEM."""
    tile = pl.program_id(0)
    col = colrow_ref[0:1, :]                       # (1, H*W) int32
    row = colrow_ref[1:2, :]                       # (1, H*W) int32
    out_is_int = jnp.issubdtype(out_ref.dtype, jnp.integer)

    def body(ib, carry):
        g = tile * b_tile + ib                     # global image index
        x = img_ref[ib]                            # (C, H*W)
        if jnp.issubdtype(x.dtype, jnp.integer):
            x = x.astype(jnp.int32)
        x = x.astype(jnp.float32)
        for d in range(depth):                     # depth is small & static
            op = ops_ref[g * depth + d]
            mag = mags_ref[g * depth + d]
            x = _apply_one_aug(x, op, mag, col, row, c=c, h=h, w=w)
        x = jnp.clip(x, 0.0, 255.0)                # single clip before store
        if out_is_int:
            x = jnp.floor(x + 0.5).astype(jnp.int32)   # round, then pack
        out_ref[ib] = x.astype(out_ref.dtype)
        return carry

    lax.fori_loop(0, b_tile, body, 0)


def sample_ops_and_mags(key, batch, depth, severity, height, width):
    """Deterministically sample the per-image augmentation schedule
    (mirrors composer's _sample_level / _int_parameter / symmetric sampling).
    Returns flat 1D (batch*depth,) tables to keep SMEM padding tiny."""
    k_op, k_lvl, k_sign = jax.random.split(key, 3)
    n = batch * depth
    ops = jax.random.randint(k_op, (n,), 0, NUM_OPS, dtype=jnp.int32)
    hi = max(float(severity), 0.1)
    level = jax.random.uniform(k_lvl, (n,), minval=min(0.1, hi), maxval=hi)
    sign = jnp.where(jax.random.bernoulli(k_sign, 0.5, (n,)), 1.0, -1.0)

    threshold = 256.0 - jnp.floor(level * 256.0 / 10.0)            # solarize
    bits = 4.0 - jnp.floor(level * 4.0 / 10.0)                     # posterize (composer: 0..4 bits)
    qstep = jnp.exp2(8.0 - bits)                                   # quantization step
    factor = 1.0 + sign * level * 0.9 / 10.0                       # brightness / contrast
    shift_x = sign * jnp.floor(level * (width / 3.0) / 10.0)       # translate_x
    shift_y = sign * jnp.floor(level * (height / 3.0) / 10.0)      # translate_y

    mags = jnp.select(
        [ops == OP_SOLARIZE, ops == OP_POSTERIZE,
         ops == OP_BRIGHTNESS, ops == OP_CONTRAST,
         ops == OP_TRANSLATE_X, ops == OP_TRANSLATE_Y],
        [threshold, qstep, factor, factor, shift_x, shift_y],
        1.0).astype(jnp.float32)
    return ops, mags


def _pick_b_tile(n, requested):
    """Keep >= 2 grid steps when possible (parallel batch axis can shard across
    v7x's two TensorCores); on 1-TC chips (v5e/v6e) pass a larger `b_tile` to
    trade grid steps for bigger DMAs. Non-divisor N is handled by padding."""
    if n <= 1:
        return 1
    return max(1, min(int(requested), pl.cdiv(n, 2)))


def randaugment_transform(img, key, severity=9, depth=2, b_tile=8):
    """Pallas equivalent of RandAugmentTransform(severity, depth).forward(img)."""
    if not (0 <= severity <= 10):
        raise ValueError('RandAugment severity value must satisfy 0 <= severity <= 10')
    if depth < 0:
        raise ValueError('RandAugment depth value must be >= 0')
    n, c, h, w = img.shape
    if depth == 0 or n == 0:
        return img
    hw = h * w

    bt = _pick_b_tile(n, b_tile)
    n_pad = ((n + bt - 1) // bt) * bt

    x = img.reshape(n, c, hw)                       # lane-dense layout (free reshape)
    if n_pad != n:                                  # pad batch to a tile multiple
        x = jnp.pad(x, ((0, n_pad - n), (0, 0), (0, 0)))

    ops, mags = sample_ops_and_mags(key, n_pad, depth, severity, h, w)
    colrow = jnp.stack(
        [jnp.tile(jnp.arange(w, dtype=jnp.int32), h),       # flat index -> column
         jnp.repeat(jnp.arange(h, dtype=jnp.int32), w)],    # flat index -> row
        axis=0)                                              # (2, H*W)

    grid = (n_pad // bt,)
    itemsize = img.dtype.itemsize
    io_bytes = 2 * 2 * bt * c * hw * itemsize        # double-buffered in + out blocks
    tmp_bytes = 12 * c * hw * 4 + 2 * 2 * hw * 4     # per-image f32 temporaries + col/row
    vmem_limit = int(min(48 * 1024 * 1024,           # v7x-safe cap (64 MiB physical)
                         max(16 * 1024 * 1024, io_bytes + tmp_bytes)))

    kernel = functools.partial(randaugment_kernel, depth=depth, b_tile=bt,
                               c=c, h=h, w=w)
    out = pl.pallas_call(
        kernel,
        out_shape=jax.ShapeDtypeStruct((n_pad, c, hw), img.dtype),
        grid=grid,
        in_specs=[
            pl.BlockSpec(memory_space=pltpu.MemorySpace.SMEM),    # ops   (N*depth,)
            pl.BlockSpec(memory_space=pltpu.MemorySpace.SMEM),    # mags  (N*depth,)
            pl.BlockSpec((2, hw), lambda i: (0, 0)),              # col/row index maps
            pl.BlockSpec((bt, c, hw), lambda i: (i, 0, 0)),       # image tile
        ],
        out_specs=pl.BlockSpec((bt, c, hw), lambda i: (i, 0, 0)),
        compiler_params=pltpu.CompilerParams(
            dimension_semantics=("parallel",),
            vmem_limit_bytes=vmem_limit),
    )(ops, mags, colrow, x)
    return out[:n].reshape(n, c, h, w)


if __name__ == "__main__":
    key = jax.random.PRNGKey(0)
    k_img, k_aug = jax.random.split(key)

    # uint8 images (1 B/pixel HBM traffic each way): N=2, C=4, H=W=16.
    img_u8 = jax.random.randint(k_img, (2, 4, 16, 16), 0, 256,
                                dtype=jnp.int32).astype(jnp.uint8)
    out_u8 = randaugment_transform(img_u8, k_aug, severity=9, depth=2)
    jax.block_until_ready(out_u8)
    assert out_u8.shape == img_u8.shape and out_u8.dtype == jnp.uint8

    # float32 path (same kernel, different I/O dtype).
    img_f32 = img_u8.astype(jnp.float32)
    out_f32 = randaugment_transform(img_f32, k_aug, severity=9, depth=2)
    jax.block_until_ready(out_f32)
    assert out_f32.shape == img_f32.shape and out_f32.dtype == jnp.float32
    assert bool(jnp.all(jnp.isfinite(out_f32)))
    assert bool(jnp.all((out_f32 >= 0.0) & (out_f32 <= 255.0)))

    print("KERNEL_OK")
</pallas_src>

<mosaic_0001>
module attributes {stable_mosaic.version = 11 : i64} {
  func.func @randaugment_kernel(%arg0: i32, %arg1: memref<4xi32, #tpu.memory_space<smem>>, %arg2: memref<4xf32, #tpu.memory_space<smem>>, %arg3: memref<2x256xi32, #tpu.memory_space<vmem>>, %arg4: memref<1x4x256xi8, #tpu.memory_space<vmem>>, %arg5: memref<1x4x256xi8, #tpu.memory_space<vmem>>) attributes {dimension_semantics = [#tpu.dimension_semantics<parallel>], iteration_bounds = array<i64: 2>, scalar_prefetch = 0 : i64, scratch_operands = 0 : i64, tpu.core_type = #tpu.core_type<tc>, window_params = [{transform_indices = @transform_0, window_bounds = array<i64: 4>}, {transform_indices = @transform_1, window_bounds = array<i64: 4>}, {pipeline_mode = #tpu.pipeline_mode<synchronous>, transform_indices = @transform_2, window_bounds = array<i64: 2, 256>}, {transform_indices = @transform_3, window_bounds = array<i64: 1, 4, 256>}, {transform_indices = @transform_4, window_bounds = array<i64: 1, 4, 256>}]} {
    %c0 = arith.constant 0 : index
    %c0_0 = arith.constant 0 : index
    %0 = vector.load %arg3[%c0, %c0_0] : memref<2x256xi32, #tpu.memory_space<vmem>>, vector<1x256xi32>
    %c1 = arith.constant 1 : index
    %c0_1 = arith.constant 0 : index
    %1 = vector.load %arg3[%c1, %c0_1] : memref<2x256xi32, #tpu.memory_space<vmem>>, vector<1x256xi32>
    %c0_i32 = arith.constant 0 : i32
    %c1_i32 = arith.constant 1 : i32
    %2 = arith.muli %arg0, %c1_i32 : i32
    %3 = arith.addi %2, %c0_i32 : i32
    %4 = arith.index_cast %c0_i32 : i32 to index
    %c0_2 = arith.constant 0 : index
    %c0_3 = arith.constant 0 : index
    %5 = vector.load %arg4[%4, %c0_2, %c0_3] : memref<1x4x256xi8, #tpu.memory_space<vmem>>, vector<1x4x256xi8>
    %6 = vector.shape_cast %5 : vector<1x4x256xi8> to vector<4x256xi8>
    %7 = arith.extui %6 : vector<4x256xi8> to vector<4x256xi32>
    %8 = arith.sitofp %7 : vector<4x256xi32> to vector<4x256xf32>
    %c2_i32 = arith.constant 2 : i32
    %9 = arith.muli %3, %c2_i32 : i32
    %c0_i32_4 = arith.constant 0 : i32
    %10 = arith.addi %9, %c0_i32_4 : i32
    %11 = arith.index_cast %10 : i32 to index
    %12 = memref.load %arg1[%11] : memref<4xi32, #tpu.memory_space<smem>>
    %c2_i32_5 = arith.constant 2 : i32
    %13 = arith.muli %3, %c2_i32_5 : i32
    %c0_i32_6 = arith.constant 0 : i32
    %14 = arith.addi %13, %c0_i32_6 : i32
    %15 = arith.index_cast %14 : i32 to index
    %16 = memref.load %arg2[%15] : memref<4xf32, #tpu.memory_space<smem>>
    %c0_i32_7 = arith.constant 0 : i32
    %c7_i32 = arith.constant 7 : i32
    %17 = arith.maxsi %12, %c0_i32_7 : i32
    %18 = arith.minsi %17, %c7_i32 : i32
    %c0_i32_8 = arith.constant 0 : i32
    %19 = arith.cmpi ne, %18, %c0_i32_8 : i32
    %20 = scf.if %19 -> (vector<4x256xf32>) {
      %c1_i32_21 = arith.constant 1 : i32
      %46 = arith.subi %18, %c1_i32_21 : i32
      %c0_i32_22 = arith.constant 0 : i32
      %47 = arith.cmpi ne, %46, %c0_i32_22 : i32
      %48 = scf.if %47 -> (vector<4x256xf32>) {
        %c1_i32_23 = arith.constant 1 : i32
        %49 = arith.subi %46, %c1_i32_23 : i32
        %c0_i32_24 = arith.constant 0 : i32
        %50 = arith.cmpi ne, %49, %c0_i32_24 : i32
        %51 = scf.if %50 -> (vector<4x256xf32>) {
          %c1_i32_25 = arith.constant 1 : i32
          %52 = arith.subi %49, %c1_i32_25 : i32
          %c0_i32_26 = arith.constant 0 : i32
          %53 = arith.cmpi ne, %52, %c0_i32_26 : i32
          %54 = scf.if %53 -> (vector<4x256xf32>) {
            %c1_i32_27 = arith.constant 1 : i32
            %55 = arith.subi %52, %c1_i32_27 : i32
            %c0_i32_28 = arith.constant 0 : i32
            %56 = arith.cmpi ne, %55, %c0_i32_28 : i32
            %57 = scf.if %56 -> (vector<4x256xf32>) {
              %c1_i32_29 = arith.constant 1 : i32
              %58 = arith.subi %55, %c1_i32_29 : i32
              %c0_i32_30 = arith.constant 0 : i32
              %59 = arith.cmpi ne, %58, %c0_i32_30 : i32
              %60 = scf.if %59 -> (vector<4x256xf32>) {
                %c1_i32_31 = arith.constant 1 : i32
                %61 = arith.subi %58, %c1_i32_31 : i32
                %c0_i32_32 = arith.constant 0 : i32
                %62 = arith.cmpi ne, %61, %c0_i32_32 : i32
                %63 = scf.if %62 -> (vector<4x256xf32>) {
                  %64 = arith.fptosi %16 : f32 to i32
                  %65 = vector.broadcast %64 : i32 to vector<1x256xi32>
                  %66 = arith.subi %1, %65 : vector<1x256xi32>
                  %c0_i32_33 = arith.constant 0 : i32
                  %67 = vector.broadcast %c0_i32_33 : i32 to vector<1x256xi32>
                  %68 = arith.cmpi sge, %66, %67 : vector<1x256xi32>
                  %69 = vector.broadcast %64 : i32 to vector<1x256xi32>
                  %70 = arith.subi %1, %69 : vector<1x256xi32>
                  %c16_i32 = arith.constant 16 : i32
                  %71 = vector.broadcast %c16_i32 : i32 to vector<1x256xi32>
                  %72 = arith.cmpi slt, %70, %71 : vector<1x256xi32>
                  %73 = arith.andi %68, %72 : vector<1x256xi1>
                  %c16_i32_34 = arith.constant 16 : i32
                  %74 = arith.muli %64, %c16_i32_34 : i32
                  %c0_i32_35 = arith.constant 0 : i32
                  %75 = arith.cmpi slt, %74, %c0_i32_35 : i32
                  %c256_i32 = arith.constant 256 : i32
                  %76 = arith.addi %74, %c256_i32 : i32
                  %77 = arith.select %75, %76, %74 : i32
                  %78 = tpu.dynamic_rotate %8 by %77 dim 1 : vector<4x256xf32>, i32 -> vector<4x256xf32>
                  %cst_36 = arith.constant 0.000000e+00 : f32
                  %79 = vector.shape_cast %73 : vector<1x256xi1> to vector<1x256xi1>
                  %80 = vector.broadcast %79 : vector<1x256xi1> to vector<4x256xi1>
                  %81 = vector.broadcast %cst_36 : f32 to vector<4x256xf32>
                  %82 = arith.select %80, %78, %81 : vector<4x256xi1>, vector<4x256xf32>
                  scf.yield %82 : vector<4x256xf32>
                } else {
                  %64 = arith.fptosi %16 : f32 to i32
                  %65 = vector.broadcast %64 : i32 to vector<1x256xi32>
                  %66 = arith.subi %0, %65 : vector<1x256xi32>
                  %c0_i32_33 = arith.constant 0 : i32
                  %67 = vector.broadcast %c0_i32_33 : i32 to vector<1x256xi32>
                  %68 = arith.cmpi sge, %66, %67 : vector<1x256xi32>
                  %69 = vector.broadcast %64 : i32 to vector<1x256xi32>
                  %70 = arith.subi %0, %69 : vector<1x256xi32>
                  %c16_i32 = arith.constant 16 : i32
                  %71 = vector.broadcast %c16_i32 : i32 to vector<1x256xi32>
                  %72 = arith.cmpi slt, %70, %71 : vector<1x256xi32>
                  %73 = arith.andi %68, %72 : vector<1x256xi1>
                  %c0_i32_34 = arith.constant 0 : i32
                  %74 = arith.cmpi slt, %64, %c0_i32_34 : i32
                  %c256_i32 = arith.constant 256 : i32
                  %75 = arith.addi %64, %c256_i32 : i32
                  %76 = arith.select %74, %75, %64 : i32
                  %77 = tpu.dynamic_rotate %8 by %76 dim 1 : vector<4x256xf32>, i32 -> vector<4x256xf32>
                  %cst_35 = arith.constant 0.000000e+00 : f32
                  %78 = vector.shape_cast %73 : vector<1x256xi1> to vector<1x256xi1>
                  %79 = vector.broadcast %78 : vector<1x256xi1> to vector<4x256xi1>
                  %80 = vector.broadcast %cst_35 : f32 to vector<4x256xf32>
                  %81 = arith.select %79, %77, %80 : vector<4x256xi1>, vector<4x256xf32>
                  scf.yield %81 : vector<4x256xf32>
                }
                scf.yield %63 : vector<4x256xf32>
              } else {
                %cst_31 = arith.constant dense<0x7F800000> : vector<4xf32>
                %61 = vector.multi_reduction <minimumf>, %8, %cst_31 [1] : vector<4x256xf32> to vector<4xf32>
                %62 = vector.shape_cast %61 : vector<4xf32> to vector<4x1xf32>
                %cst_32 = arith.constant dense<0xFF800000> : vector<4xf32>
                %63 = vector.multi_reduction <maximumf>, %8, %cst_32 [1] : vector<4x256xf32> to vector<4xf32>
                %64 = vector.shape_cast %63 : vector<4xf32> to vector<4x1xf32>
                %65 = arith.subf %64, %62 : vector<4x1xf32>
                %cst_33 = arith.constant 9.99999997E-7 : f32
                %66 = vector.broadcast %cst_33 : f32 to vector<4x1xf32>
                %67 = arith.maximumf %65, %66 : vector<4x1xf32>
                %cst_34 = arith.constant 2.550000e+02 : f32
                %68 = vector.broadcast %cst_34 : f32 to vector<4x1xf32>
                %69 = arith.divf %68, %67 : vector<4x1xf32>
                %70 = arith.cmpf ogt, %64, %62 : vector<4x1xf32>
                %71 = vector.broadcast %62 : vector<4x1xf32> to vector<4x256xf32>
                %72 = arith.subf %8, %71 : vector<4x256xf32>
                %73 = vector.broadcast %69 : vector<4x1xf32> to vector<4x256xf32>
                %74 = arith.mulf %72, %73 : vector<4x256xf32>
                %75 = vector.shape_cast %70 : vector<4x1xi1> to vector<4x1xi1>
                %76 = vector.broadcast %75 : vector<4x1xi1> to vector<4x256xi1>
                %77 = arith.select %76, %74, %8 : vector<4x256xi1>, vector<4x256xf32>
                scf.yield %77 : vector<4x256xf32>
              }
              scf.yield %60 : vector<4x256xf32>
            } else {
              %58 = vector.extract_strided_slice %8 {offsets = [0, 0], sizes = [1, 256], strides = [1, 1]} : vector<4x256xf32> to vector<1x256xf32>
              %cst_29 = arith.constant 2.990000e-01 : f32
              %59 = vector.broadcast %cst_29 : f32 to vector<1x256xf32>
              %60 = arith.mulf %59, %58 : vector<1x256xf32>
              %61 = vector.extract_strided_slice %8 {offsets = [1, 0], sizes = [1, 256], strides = [1, 1]} : vector<4x256xf32> to vector<1x256xf32>
              %cst_30 = arith.constant 5.870000e-01 : f32
              %62 = vector.broadcast %cst_30 : f32 to vector<1x256xf32>
              %63 = arith.mulf %62, %61 : vector<1x256xf32>
              %64 = arith.addf %60, %63 : vector<1x256xf32>
              %65 = vector.extract_strided_slice %8 {offsets = [2, 0], sizes = [1, 256], strides = [1, 1]} : vector<4x256xf32> to vector<1x256xf32>
              %cst_31 = arith.constant 1.140000e-01 : f32
              %66 = vector.broadcast %cst_31 : f32 to vector<1x256xf32>
              %67 = arith.mulf %66, %65 : vector<1x256xf32>
              %68 = arith.addf %64, %67 : vector<1x256xf32>
              %69 = math.floor %68 : vector<1x256xf32>
              %70 = vector.shape_cast %69 : vector<1x256xf32> to vector<1x1x256xf32>
              %cst_32 = arith.constant dense<0.000000e+00> : vector<1xf32>
              %71 = vector.multi_reduction <add>, %70, %cst_32 [1, 2] : vector<1x1x256xf32> to vector<1xf32>
              %72 = vector.shape_cast %71 : vector<1xf32> to vector<1x1x1xf32>
              %73 = vector.extract %72[0, 0, 0] : f32 from vector<1x1x1xf32>
              %74 = vector.broadcast %73 : f32 to vector<1x1xf32>
              %cst_33 = arith.constant 2.560000e+02 : f32
              %75 = vector.broadcast %cst_33 : f32 to vector<1x1xf32>
              %76 = arith.divf %74, %75 : vector<1x1xf32>
              %cst_34 = arith.constant 5.000000e-01 : f32
              %77 = vector.broadcast %cst_34 : f32 to vector<1x1xf32>
              %78 = arith.addf %76, %77 : vector<1x1xf32>
              %79 = math.floor %78 : vector<1x1xf32>
              %80 = vector.broadcast %79 : vector<1x1xf32> to vector<4x256xf32>
              %81 = arith.subf %8, %80 : vector<4x256xf32>
              %82 = vector.broadcast %16 : f32 to vector<4x256xf32>
              %83 = arith.mulf %81, %82 : vector<4x256xf32>
              %84 = vector.broadcast %79 : vector<1x1xf32> to vector<4x256xf32>
              %85 = arith.addf %83, %84 : vector<4x256xf32>
              %cst_35 = arith.constant 0.000000e+00 : f32
              %cst_36 = arith.constant 2.550000e+02 : f32
              %86 = vector.broadcast %cst_35 : f32 to vector<4x256xf32>
              %87 = arith.maximumf %86, %85 : vector<4x256xf32>
              %88 = vector.broadcast %cst_36 : f32 to vector<4x256xf32>
              %89 = arith.minimumf %88, %87 : vector<4x256xf32>
              scf.yield %89 : vector<4x256xf32>
            }
            scf.yield %57 : vector<4x256xf32>
          } else {
            %55 = vector.broadcast %16 : f32 to vector<4x256xf32>
            %56 = arith.mulf %8, %55 : vector<4x256xf32>
            %cst_27 = arith.constant 0.000000e+00 : f32
            %cst_28 = arith.constant 2.550000e+02 : f32
            %57 = vector.broadcast %cst_27 : f32 to vector<4x256xf32>
            %58 = arith.maximumf %57, %56 : vector<4x256xf32>
            %59 = vector.broadcast %cst_28 : f32 to vector<4x256xf32>
            %60 = arith.minimumf %59, %58 : vector<4x256xf32>
            scf.yield %60 : vector<4x256xf32>
          }
          scf.yield %54 : vector<4x256xf32>
        } else {
          %cst_25 = arith.constant 1.000000e+00 : f32
          %52 = arith.maximumf %16, %cst_25 : f32
          %53 = vector.broadcast %52 : f32 to vector<4x256xf32>
          %54 = arith.divf %8, %53 : vector<4x256xf32>
          %55 = math.floor %54 : vector<4x256xf32>
          %56 = vector.broadcast %52 : f32 to vector<4x256xf32>
          %57 = arith.mulf %55, %56 : vector<4x256xf32>
          scf.yield %57 : vector<4x256xf32>
        }
        scf.yield %51 : vector<4x256xf32>
      } else {
        %49 = vector.broadcast %16 : f32 to vector<4x256xf32>
        %50 = arith.cmpf olt, %8, %49 : vector<4x256xf32>
        %cst_23 = arith.constant 2.550000e+02 : f32
        %51 = vector.broadcast %cst_23 : f32 to vector<4x256xf32>
        %52 = arith.subf %51, %8 : vector<4x256xf32>
        %53 = arith.select %50, %8, %52 : vector<4x256xi1>, vector<4x256xf32>
        scf.yield %53 : vector<4x256xf32>
      }
      scf.yield %48 : vector<4x256xf32>
    } else {
      scf.yield %8 : vector<4x256xf32>
    }
    %c2_i32_9 = arith.constant 2 : i32
    %21 = arith.muli %3, %c2_i32_9 : i32
    %c1_i32_10 = arith.constant 1 : i32
    %22 = arith.addi %21, %c1_i32_10 : i32
    %23 = arith.index_cast %22 : i32 to index
    %24 = memref.load %arg1[%23] : memref<4xi32, #tpu.memory_space<smem>>
    %c2_i32_11 = arith.constant 2 : i32
    %25 = arith.muli %3, %c2_i32_11 : i32
    %c1_i32_12 = arith.constant 1 : i32
    %26 = arith.addi %25, %c1_i32_12 : i32
    %27 = arith.index_cast %26 : i32 to index
    %28 = memref.load %arg2[%27] : memref<4xf32, #tpu.memory_space<smem>>
    %c0_i32_13 = arith.constant 0 : i32
    %c7_i32_14 = arith.constant 7 : i32
    %29 = arith.maxsi %24, %c0_i32_13 : i32
    %30 = arith.minsi %29, %c7_i32_14 : i32
    %c0_i32_15 = arith.constant 0 : i32
    %31 = arith.cmpi ne, %30, %c0_i32_15 : i32
    %32 = scf.if %31 -> (vector<4x256xf32>) {
      %c1_i32_21 = arith.constant 1 : i32
      %46 = arith.subi %30, %c1_i32_21 : i32
      %c0_i32_22 = arith.constant 0 : i32
      %47 = arith.cmpi ne, %46, %c0_i32_22 : i32
      %48 = scf.if %47 -> (vector<4x256xf32>) {
        %c1_i32_23 = arith.constant 1 : i32
        %49 = arith.subi %46, %c1_i32_23 : i32
        %c0_i32_24 = arith.constant 0 : i32
        %50 = arith.cmpi ne, %49, %c0_i32_24 : i32
        %51 = scf.if %50 -> (vector<4x256xf32>) {
          %c1_i32_25 = arith.constant 1 : i32
          %52 = arith.subi %49, %c1_i32_25 : i32
          %c0_i32_26 = arith.constant 0 : i32
          %53 = arith.cmpi ne, %52, %c0_i32_26 : i32
          %54 = scf.if %53 -> (vector<4x256xf32>) {
            %c1_i32_27 = arith.constant 1 : i32
            %55 = arith.subi %52, %c1_i32_27 : i32
            %c0_i32_28 = arith.constant 0 : i32
            %56 = arith.cmpi ne, %55, %c0_i32_28 : i32
            %57 = scf.if %56 -> (vector<4x256xf32>) {
              %c1_i32_29 = arith.constant 1 : i32
              %58 = arith.subi %55, %c1_i32_29 : i32
              %c0_i32_30 = arith.constant 0 : i32
              %59 = arith.cmpi ne, %58, %c0_i32_30 : i32
              %60 = scf.if %59 -> (vector<4x256xf32>) {
                %c1_i32_31 = arith.constant 1 : i32
                %61 = arith.subi %58, %c1_i32_31 : i32
                %c0_i32_32 = arith.constant 0 : i32
                %62 = arith.cmpi ne, %61, %c0_i32_32 : i32
                %63 = scf.if %62 -> (vector<4x256xf32>) {
                  %64 = arith.fptosi %28 : f32 to i32
                  %65 = vector.broadcast %64 : i32 to vector<1x256xi32>
                  %66 = arith.subi %1, %65 : vector<1x256xi32>
                  %c0_i32_33 = arith.constant 0 : i32
                  %67 = vector.broadcast %c0_i32_33 : i32 to vector<1x256xi32>
                  %68 = arith.cmpi sge, %66, %67 : vector<1x256xi32>
                  %69 = vector.broadcast %64 : i32 to vector<1x256xi32>
                  %70 = arith.subi %1, %69 : vector<1x256xi32>
                  %c16_i32 = arith.constant 16 : i32
                  %71 = vector.broadcast %c16_i32 : i32 to vector<1x256xi32>
                  %72 = arith.cmpi slt, %70, %71 : vector<1x256xi32>
                  %73 = arith.andi %68, %72 : vector<1x256xi1>
                  %c16_i32_34 = arith.constant 16 : i32
                  %74 = arith.muli %64, %c16_i32_34 : i32
                  %c0_i32_35 = arith.constant 0 : i32
                  %75 = arith.cmpi slt, %74, %c0_i32_35 : i32
                  %c256_i32 = arith.constant 256 : i32
                  %76 = arith.addi %74, %c256_i32 : i32
                  %77 = arith.select %75, %76, %74 : i32
                  %78 = tpu.dynamic_rotate %20 by %77 dim 1 : vector<4x256xf32>, i32 -> vector<4x256xf32>
                  %cst_36 = arith.constant 0.000000e+00 : f32
                  %79 = vector.shape_cast %73 : vector<1x256xi1> to vector<1x256xi1>
                  %80 = vector.broadcast %79 : vector<1x256xi1> to vector<4x256xi1>
                  %81 = vector.broadcast %cst_36 : f32 to vector<4x256xf32>
                  %82 = arith.select %80, %78, %81 : vector<4x256xi1>, vector<4x256xf32>
                  scf.yield %82 : vector<4x256xf32>
                } else {
                  %64 = arith.fptosi %28 : f32 to i32
                  %65 = vector.broadcast %64 : i32 to vector<1x256xi32>
                  %66 = arith.subi %0, %65 : vector<1x256xi32>
                  %c0_i32_33 = arith.constant 0 : i32
                  %67 = vector.broadcast %c0_i32_33 : i32 to vector<1x256xi32>
                  %68 = arith.cmpi sge, %66, %67 : vector<1x256xi32>
                  %69 = vector.broadcast %64 : i32 to vector<1x256xi32>
                  %70 = arith.subi %0, %69 : vector<1x256xi32>
                  %c16_i32 = arith.constant 16 : i32
                  %71 = vector.broadcast %c16_i32 : i32 to vector<1x256xi32>
                  %72 = arith.cmpi slt, %70, %71 : vector<1x256xi32>
                  %73 = arith.andi %68, %72 : vector<1x256xi1>
                  %c0_i32_34 = arith.constant 0 : i32
                  %74 = arith.cmpi slt, %64, %c0_i32_34 : i32
                  %c256_i32 = arith.constant 256 : i32
                  %75 = arith.addi %64, %c256_i32 : i32
                  %76 = arith.select %74, %75, %64 : i32
                  %77 = tpu.dynamic_rotate %20 by %76 dim 1 : vector<4x256xf32>, i32 -> vector<4x256xf32>
                  %cst_35 = arith.constant 0.000000e+00 : f32
                  %78 = vector.shape_cast %73 : vector<1x256xi1> to vector<1x256xi1>
                  %79 = vector.broadcast %78 : vector<1x256xi1> to vector<4x256xi1>
                  %80 = vector.broadcast %cst_35 : f32 to vector<4x256xf32>
                  %81 = arith.select %79, %77, %80 : vector<4x256xi1>, vector<4x256xf32>
                  scf.yield %81 : vector<4x256xf32>
                }
                scf.yield %63 : vector<4x256xf32>
              } else {
                %cst_31 = arith.constant dense<0x7F800000> : vector<4xf32>
                %61 = vector.multi_reduction <minimumf>, %20, %cst_31 [1] : vector<4x256xf32> to vector<4xf32>
                %62 = vector.shape_cast %61 : vector<4xf32> to vector<4x1xf32>
                %cst_32 = arith.constant dense<0xFF800000> : vector<4xf32>
                %63 = vector.multi_reduction <maximumf>, %20, %cst_32 [1] : vector<4x256xf32> to vector<4xf32>
                %64 = vector.shape_cast %63 : vector<4xf32> to vector<4x1xf32>
                %65 = arith.subf %64, %62 : vector<4x1xf32>
                %cst_33 = arith.constant 9.99999997E-7 : f32
                %66 = vector.broadcast %cst_33 : f32 to vector<4x1xf32>
                %67 = arith.maximumf %65, %66 : vector<4x1xf32>
                %cst_34 = arith.constant 2.550000e+02 : f32
                %68 = vector.broadcast %cst_34 : f32 to vector<4x1xf32>
                %69 = arith.divf %68, %67 : vector<4x1xf32>
                %70 = arith.cmpf ogt, %64, %62 : vector<4x1xf32>
                %71 = vector.broadcast %62 : vector<4x1xf32> to vector<4x256xf32>
                %72 = arith.subf %20, %71 : vector<4x256xf32>
                %73 = vector.broadcast %69 : vector<4x1xf32> to vector<4x256xf32>
                %74 = arith.mulf %72, %73 : vector<4x256xf32>
                %75 = vector.shape_cast %70 : vector<4x1xi1> to vector<4x1xi1>
                %76 = vector.broadcast %75 : vector<4x1xi1> to vector<4x256xi1>
                %77 = arith.select %76, %74, %20 : vector<4x256xi1>, vector<4x256xf32>
                scf.yield %77 : vector<4x256xf32>
              }
              scf.yield %60 : vector<4x256xf32>
            } else {
              %58 = vector.extract_strided_slice %20 {offsets = [0, 0], sizes = [1, 256], strides = [1, 1]} : vector<4x256xf32> to vector<1x256xf32>
              %cst_29 = arith.constant 2.990000e-01 : f32
              %59 = vector.broadcast %cst_29 : f32 to vector<1x256xf32>
              %60 = arith.mulf %59, %58 : vector<1x256xf32>
              %61 = vector.extract_strided_slice %20 {offsets = [1, 0], sizes = [1, 256], strides = [1, 1]} : vector<4x256xf32> to vector<1x256xf32>
              %cst_30 = arith.constant 5.870000e-01 : f32
              %62 = vector.broadcast %cst_30 : f32 to vector<1x256xf32>
              %63 = arith.mulf %62, %61 : vector<1x256xf32>
              %64 = arith.addf %60, %63 : vector<1x256xf32>
              %65 = vector.extract_strided_slice %20 {offsets = [2, 0], sizes = [1, 256], strides = [1, 1]} : vector<4x256xf32> to vector<1x256xf32>
              %cst_31 = arith.constant 1.140000e-01 : f32
              %66 = vector.broadcast %cst_31 : f32 to vector<1x256xf32>
              %67 = arith.mulf %66, %65 : vector<1x256xf32>
              %68 = arith.addf %64, %67 : vector<1x256xf32>
              %69 = math.floor %68 : vector<1x256xf32>
              %70 = vector.shape_cast %69 : vector<1x256xf32> to vector<1x1x256xf32>
              %cst_32 = arith.constant dense<0.000000e+00> : vector<1xf32>
              %71 = vector.multi_reduction <add>, %70, %cst_32 [1, 2] : vector<1x1x256xf32> to vector<1xf32>
              %72 = vector.shape_cast %71 : vector<1xf32> to vector<1x1x1xf32>
              %73 = vector.extract %72[0, 0, 0] : f32 from vector<1x1x1xf32>
              %74 = vector.broadcast %73 : f32 to vector<1x1xf32>
              %cst_33 = arith.constant 2.560000e+02 : f32
              %75 = vector.broadcast %cst_33 : f32 to vector<1x1xf32>
              %76 = arith.divf %74, %75 : vector<1x1xf32>
              %cst_34 = arith.constant 5.000000e-01 : f32
              %77 = vector.broadcast %cst_34 : f32 to vector<1x1xf32>
              %78 = arith.addf %76, %77 : vector<1x1xf32>
              %79 = math.floor %78 : vector<1x1xf32>
              %80 = vector.broadcast %79 : vector<1x1xf32> to vector<4x256xf32>
              %81 = arith.subf %20, %80 : vector<4x256xf32>
              %82 = vector.broadcast %28 : f32 to vector<4x256xf32>
              %83 = arith.mulf %81, %82 : vector<4x256xf32>
              %84 = vector.broadcast %79 : vector<1x1xf32> to vector<4x256xf32>
              %85 = arith.addf %83, %84 : vector<4x256xf32>
              %cst_35 = arith.constant 0.000000e+00 : f32
              %cst_36 = arith.constant 2.550000e+02 : f32
              %86 = vector.broadcast %cst_35 : f32 to vector<4x256xf32>
              %87 = arith.maximumf %86, %85 : vector<4x256xf32>
              %88 = vector.broadcast %cst_36 : f32 to vector<4x256xf32>
              %89 = arith.minimumf %88, %87 : vector<4x256xf32>
              scf.yield %89 : vector<4x256xf32>
            }
            scf.yield %57 : vector<4x256xf32>
          } else {
            %55 = vector.broadcast %28 : f32 to vector<4x256xf32>
            %56 = arith.mulf %20, %55 : vector<4x256xf32>
            %cst_27 = arith.constant 0.000000e+00 : f32
            %cst_28 = arith.constant 2.550000e+02 : f32
            %57 = vector.broadcast %cst_27 : f32 to vector<4x256xf32>
            %58 = arith.maximumf %57, %56 : vector<4x256xf32>
            %59 = vector.broadcast %cst_28 : f32 to vector<4x256xf32>
            %60 = arith.minimumf %59, %58 : vector<4x256xf32>
            scf.yield %60 : vector<4x256xf32>
          }
          scf.yield %54 : vector<4x256xf32>
        } else {
          %cst_25 = arith.constant 1.000000e+00 : f32
          %52 = arith.maximumf %28, %cst_25 : f32
          %53 = vector.broadcast %52 : f32 to vector<4x256xf32>
          %54 = arith.divf %20, %53 : vector<4x256xf32>
          %55 = math.floor %54 : vector<4x256xf32>
          %56 = vector.broadcast %52 : f32 to vector<4x256xf32>
          %57 = arith.mulf %55, %56 : vector<4x256xf32>
          scf.yield %57 : vector<4x256xf32>
        }
        scf.yield %51 : vector<4x256xf32>
      } else {
        %49 = vector.broadcast %28 : f32 to vector<4x256xf32>
        %50 = arith.cmpf olt, %20, %49 : vector<4x256xf32>
        %cst_23 = arith.constant 2.550000e+02 : f32
        %51 = vector.broadcast %cst_23 : f32 to vector<4x256xf32>
        %52 = arith.subf %51, %20 : vector<4x256xf32>
        %53 = arith.select %50, %20, %52 : vector<4x256xi1>, vector<4x256xf32>
        scf.yield %53 : vector<4x256xf32>
      }
      scf.yield %48 : vector<4x256xf32>
    } else {
      scf.yield %20 : vector<4x256xf32>
    }
    %cst = arith.constant 0.000000e+00 : f32
    %cst_16 = arith.constant 2.550000e+02 : f32
    %33 = vector.broadcast %cst : f32 to vector<4x256xf32>
    %34 = arith.maximumf %33, %32 : vector<4x256xf32>
    %35 = vector.broadcast %cst_16 : f32 to vector<4x256xf32>
    %36 = arith.minimumf %35, %34 : vector<4x256xf32>
    %cst_17 = arith.constant 5.000000e-01 : f32
    %37 = vector.broadcast %cst_17 : f32 to vector<4x256xf32>
    %38 = arith.addf %36, %37 : vector<4x256xf32>
    %39 = math.floor %38 : vector<4x256xf32>
    %40 = arith.fptosi %39 : vector<4x256xf32> to vector<4x256xi32>
    %41 = arith.trunci %40 : vector<4x256xi32> to vector<4x256xi8>
    %42 = arith.index_cast %c0_i32 : i32 to index
    %c0_18 = arith.constant 0 : index
    %c0_19 = arith.constant 0 : index
    %43 = vector.load %arg5[%42, %c0_18, %c0_19] : memref<1x4x256xi8, #tpu.memory_space<vmem>>, vector<1x4x256xi8>
    %44 = vector.shape_cast %43 : vector<1x4x256xi8> to vector<4x256xi8>
    %45 = vector.shape_cast %41 : vector<4x256xi8> to vector<1x4x256xi8>
    tpu.vector_store %arg5[%42, %c0_18, %c0_19], %45 {strides = array<i32>} : memref<1x4x256xi8, #tpu.memory_space<vmem>>, vector<1x4x256xi8>,
    %c1_i32_20 = arith.constant 1 : i32
    return
  }
  func.func @transform_0(%arg0: i32) -> i32 {
    %c0_i32 = arith.constant 0 : i32
    %c0_i32_0 = arith.constant 0 : i32
    return %c0_i32 : i32
  }
  func.func @transform_1(%arg0: i32) -> i32 {
    %c0_i32 = arith.constant 0 : i32
    %c0_i32_0 = arith.constant 0 : i32
    return %c0_i32 : i32
  }
  func.func @transform_2(%arg0: i32) -> (i32, i32) {
    %c0_i32 = arith.constant 0 : i32
    %c0_i32_0 = arith.constant 0 : i32
    %c0_i32_1 = arith.constant 0 : i32
    return %c0_i32, %c0_i32_0 : i32, i32
  }
  func.func @transform_3(%arg0: i32) -> (i32, i32, i32) {
    %c0_i32 = arith.constant 0 : i32
    %c0_i32_0 = arith.constant 0 : i32
    %c0_i32_1 = arith.constant 0 : i32
    return %arg0, %c0_i32, %c0_i32_0 : i32, i32, i32
  }
  func.func @transform_4(%arg0: i32) -> (i32, i32, i32) {
    %c0_i32 = arith.constant 0 : i32
    %c0_i32_0 = arith.constant 0 : i32
    %c0_i32_1 = arith.constant 0 : i32
    return %arg0, %c0_i32, %c0_i32_0 : i32, i32, i32
  }
}

</mosaic_0001>

<bundles_post_ra>
// kernel: tpu_custom_call.1
= control target key start
LH: loop header
LB: loop body
LE: loop exit
PB: predicated region body
PF: predicated region fallthrough
CT: control target
= control target key end

     0   :  { %s2440_s0 = inlined_call_operand.hbm [shape: s32[4], index: 0, kind: input, shape index: {}]   ;;  %s2441_s1 = inlined_call_operand.vmem [shape: f32[4], index: 1, kind: input, shape index: {}]   ;;  %s2442_s2 = inlined_call_operand.vmem [shape: s32[2,256], index: 2, kind: input, shape index: {}]   ;;  %s2443_s3 = inlined_call_operand.vmem [shape: u8[2,4,256], index: 3, kind: input, shape index: {}]   ;;  %s2444_s4 = inlined_call_operand.hbm [shape: u8[2,4,256], index: 4, kind: output, shape index: {}]  }
   0x1   :  { %2447 = sst [smem:[#allocation11_spill]] %s2440_s0 }
   0x2   :  { %9 = vsyncpa [#allocation4], 0 }
   0x3   :  { %10 = vsyncpa [#allocation5], 0 }
   0x4   :  { %11 = vsyncpa [#allocation3], 0 }
   0x5   :  { %13 = vsyncpa [#allocation3 + $0x1], 0  ;;  %s1949_s15 = smov 0   ;;  %s1951_s16 = smov 0  }
   0x6   :  { %s1953_s17 = smov 0   ;;  %s1955_s18 = smov 0  }
   0x7 LB: > { %s1970_s19 = sadd.s32 4294967295, %s1751_s18   ;;  %s925_s20 = sadd.s32 4294967294, %s1751_s18   ;;  %s1751_s18 = sphi %s1955_s18, %s2476_s18   ;;  %s1747_s17 = sphi %s1953_s17, %s2475_s17   ;;  %s1743_s16 = sphi %s1951_s16, %s2474_s16   ;;  %s1739_s15 = sphi %s1949_s15, %s2473_s15  }
   0x8   : > { %s1974_s21 = sadd.s32 1, %s1751_s18   ;;  %s115_s22 = sadd.s32 1, %s1747_s17 }
   0x9   : > { %s112_s23 = ssub.s32 %s1751_s18, %s1974_s21  ;;  %p125_p0 = scmp.ne.s32.totalorder %s1747_s17, %s1743_s16 }
   0xa   : > { %p113_p1 = scmp.eq.s32.totalorder %s112_s23, 0  ;;  %p126_p2 = scmp.eq.s32.totalorder %s1970_s19, 1 }
   0xb   : > { %p131_p3 = scmp.ne.s32.totalorder %s1743_s16, %s1739_s15  ;;  %p132_p4 = scmp.eq.s32.totalorder %s925_s20, 1 }
   0xc   : > { %s1985_s24 = scalar_select %p113_p1, %s1747_s17, %s115_s22  }
   0xd   : > { %p1987_p5 = por %p126_p2, %p125_p0  ;;  %p1991_p6 = por %p132_p4, %p131_p3 }
   0xe   : > { %p926_p7 = scmp.ge.s32.totalorder %s1751_s18, 1  ;;  %p139_p8 = scmp.lt.s32.totalorder %s1751_s18, 3 }
   0xf   : > { %s2449_s26 = scalar_select %p1991_p6, 1, 0 }
  0x10   : > { %p1997_p9 = pnand %p926_p7, %p139_p8  ;;  %p2445_p10 = scmp.eq.s32.totalorder %s1970_s19, 0 }
  0x11   : > { %s161_s30 = sshll.u32 %s2441_s1, 4  ;;  %s2452_s0 = sld [smem:[#allocation11_spill]]  ;;  %s162_s30 = int_to_ptr.vmem [resolvable:$true] %s161_s30 }
  0x12   : > { %p1099_p11 = pneg %p1997_p9 }
  0x14   : > { %p2009_p12 = pnand %p2445_p10, %p1099_p11 }
  0x16   : > { %p1495_p0 = pneg %p2009_p12 }
  0x17   : > { %s1493_s8 = scalar_lea.hbm %s2452_s0, 16 }
  0x18   : > { %p1494_p13 = scmp.ne.s32.totalorder %s2452_s0, %s1493_s8  ;;  %p1500_p3 = scmp.lt.u32.totalorder %s1493_s8, %s2452_s0 }
  0x1a   : > { %p1496_p1 = pnand %p1495_p0, %p1494_p13 }
  0x1c   : > { %p1497_p2 = pneg %p1496_p1 }
  0x1e   : > { %p1502_p4 = pnand %p1500_p3, %p1497_p2 }
  0x20   : > { %1505 = shalt.err (!%p1502_p4)
}
  0x21   : > { %s1913_s13 = smov [#allocation2]   ;;  %s1506_s22 = scalar_lea.vmem %s162_s30, 16 }
  0x22   : > { %1102 = dma.hbm_to_smem (!%p2009_p12), %s2452_s0, 16, %s1913_s13, [#allocation4]  }
  0x23   : > { %p1507_p7 = scmp.ne.s32.totalorder %s162_s30, %s1506_s22  ;;  %p1514_p10 = scmp.lt.s32.totalorder %s162_s30, %s162_s30 }
  0x24   : > { %p1515_p13 = scmp.lt.s32.totalorder %s1506_s22, %s1506_s22 }
  0x25   : > { %p1509_p8 = pnand %p1507_p7, %p1495_p0 }
  0x26   : > { %p1516_p1 = por %p1515_p13, %p1514_p10 }
  0x27   : > { %p1510_p11 = pneg %p1509_p8 }
  0x29   : > { %p1517_p6 = pnand %p1516_p1, %p1510_p11 }
  0x2b   : > { %1520 = shalt.err (!%p1517_p6)
}
  0x2c   : > { %s1914_s23 = smov [#allocation6]   ;;  %184 = sbr.rel (%p1997_p9) target bundleno = 1646 (0x66e), region = 36 }
  0x2d   : > { %1105 = dma.vmem_to_smem (!%p2009_p12), %s162_s30, 16, %s1914_s23, [#allocation5]  }
  0x2e   : > { %p2453_p2 = scmp.eq.s32.totalorder (!%p1997_p9), %s1970_s19, 0 }
  0x33   : > { %1726 = dma.done.wait (%p2453_p2), [#allocation4], 16   ;;  %p2454_p3 = pmov %p2453_p2 }
  0x34   : > { %p2455_p0 = pmov %p2453_p2 }
  0x35   : > { %1728 = vsyncadd (%p2454_p3), [#allocation4], 4294967280 }
  0x36   : > { %1730 = dma.done.wait (%p2455_p0), [#allocation5], 16   ;;  %p2456_p10 = pmov %p2455_p0 }
  0x38   : > { %1732 = vsyncadd (%p2456_p10), [#allocation5], 4294967280 }
  0x39   : > { %194 = sfence }
  0x3a   : > { %s2446_s27 = sand.u32 1, %s1743_s16   ;;  %p214_p6 = scmp.lt.s32.totalorder %s1970_s19, 1  ;;  %v2046_v0 = vld [vmem:[%s2442_s2] ss:$2 sm:$0x3]  ;;  %v2074_v6 = vmov 0  }
  0x3b   : > { %s2050_s30 = sshll.u32 %s2446_s27, 1  ;;  %v2055_v1 = vld [vmem:[%s2442_s2 + $0x1] ss:$2 sm:$0x3]  ;;  %s2058_s7 = sshll.u32 %s1970_s19, 1  ;;  %v2076_v7 = vmov 0  }
  0x3c   : > { %s226_s8 = sld [smem:[#allocation2 + %s2058_s7]] }
  0x3d   : > { %s215_s9 = scalar_select %p214_p6, %s1970_s19, 1 }
  0x3e   : > { %s2063_s10 = sld [smem:[#allocation6 + %s2058_s7]] }
  0x3f   : > { %s934_s11 = sshll.u32 %s215_s9, 1 }
  0x40   : > { %s217_s14 = scalar_lea.vmem %s2443_s3, %s934_s11 }
  0x41   : > { %v221_v2 = vld [vmem:[%s217_s14] sm:$0x3] }
  0x42   : > { %v222_v3 = vunpack.c.0.s8 %v221_v2  ;;  %p228_p9 = scmp.gt.s32.totalorder %s226_s8, 0  ;;  %p937_p12 = scmp.lt.s32.totalorder %s226_s8, 7 }
  0x44   : > { %v223_v4 = vand.u32 255, %v222_v3  ;;  %s2478_s8 = smov (!%p228_p9, %s226_s8), 0 }
  0x45   : > { %s2480_s8 = smov (!%p937_p12, %s2478_s8), 7 }
  0x46   : > { %v2068_v5 = vcvt.s32.f32 %v223_v4  ;;  %p942_p4 = scmp.eq.s32.totalorder %s2480_s8, 0 }
  0x47   : > { %s943_s22 = sadd.s32 (!%p942_p4), 4294967295, %s2480_s8  ;;  %v2085_v8 = vmov (!%p942_p4), 0   ;;  %v2087_v9 = vmov (!%p942_p4), 0  }
  0x48   : > { %235 = sbr.rel (%p942_p4) target bundleno = 840 (0x348), region = 48  ;;  %p2081_p7 = scmp.eq.s32.totalorder (!%p942_p4), %s943_s22, 0 }
  0x4f   : > { %240 = sbr.rel (%p2081_p7) target bundleno = 834 (0x342), region = 52  ;;  %s945_s28 = sadd.s32 (!%p2081_p7), 4294967294, %s2480_s8  ;;  %v2096_v10 = vmov (!%p2081_p7), 0   ;;  %v2098_v11 = vmov (!%p2081_p7), 0  }
  0x50   : > { %p2092_p8 = scmp.eq.s32.totalorder (!%p2081_p7), %s945_s28, 0 }
  0x56   : > { %245 = sbr.rel (%p2092_p8) target bundleno = 811 (0x32b), region = 56  ;;  %s947_s5 = sadd.s32 (!%p2092_p8), 4294967293, %s2480_s8  ;;  %v2107_v12 = vmov (!%p2092_p8), 0   ;;  %v2109_v13 = vmov (!%p2092_p8), 0  }
  0x57   : > { %p2103_p11 = scmp.eq.s32.totalorder (!%p2092_p8), %s947_s5, 0 }
  0x5d   : > { %250 = sbr.rel (%p2103_p11) target bundleno = 801 (0x321), region = 60  ;;  %s949_s9 = sadd.s32 (!%p2103_p11), 4294967292, %s2480_s8  ;;  %v2118_v14 = vmov (!%p2103_p11), 0   ;;  %v2120_v15 = vmov (!%p2103_p11), 0  }
  0x5e   : > { %p2114_p13 = scmp.ne.s32.totalorder (!%p2103_p11), %s949_s9, 0  ;;  %p950_p1 = scmp.eq.s32.totalorder (!%p2103_p11), %s949_s9, 0 }
  0x64   : > { %255 = sbr.rel (%p950_p1) target bundleno = 564 (0x234), region = 64  ;;  %s951_s12 = sadd.s32 (!%p950_p1), 4294967291, %s2480_s8  ;;  %v2127_v16 = vmov (!%p950_p1), 0   ;;  %v2129_v17 = vmov (!%p950_p1), 0  }
  0x65   : > { %p2123_p2 = scmp.ne.s32.totalorder (!%p950_p1), %s951_s12, 0  ;;  %p952_p3 = scmp.eq.s32.totalorder (!%p950_p1), %s951_s12, 0 }
  0x6b   : > { %260 = sbr.rel (%p952_p3) target bundleno = 389 (0x185), region = 68  ;;  %s953_s14 = sadd.s32 (!%p952_p3), 4294967290, %s2480_s8  ;;  %v1753_v16 = vmov (!%p952_p3), 0   ;;  %v1757_v17 = vmov (!%p952_p3), 0  }
  0x6c   : > { %p2132_p0 = scmp.ne.s32.totalorder (!%p952_p3), %s953_s14, 0  ;;  %p954_p10 = scmp.eq.s32.totalorder (!%p952_p3), %s953_s14, 0 }
  0x72   : > { %265 = sbr.rel (%p954_p10) target bundleno = 252 (0xfc), region = 72  ;;  %p989_p6 = scmp.lt.s32.totalorder (!%p954_p10), %s2063_s10, 0  ;;  %v277_v18 = vcombine.high (!%p954_p10), %v2068_v5, %v2068_v5  ;;  %v287_v21 = vlaneseq (!%p954_p10)  ;;  %v1915_v25 = vmov (!%p954_p10), 0  }
  0x73   : > { %s990_s28 = sceil.f32 (!%p954_p10), %s2063_s10  ;;  %s991_s5 = sfloor.f32 (!%p954_p10), %s2063_s10 }
  0x74   : > { %v299_v22 = vshrl.u32 (!%p954_p10), %v287_v21, 7  ;;  %v288_v27 = vand.u32 (!%p954_p10), 127, %v287_v21 }
  0x76   : > { %v300_v23 = vsub.s32 (!%p954_p10), 0, %v299_v22  ;;  %v304_v24 = vsub.s32 (!%p954_p10), 1, %v299_v22 }
  0x79   : > { %s2482_s28 = smov (!%p989_p6, %s990_s28), %s991_s5 }
  0x7a   : > { %s993_s9 = scvt.f32.s32 %s2482_s28 }
  0x7c   : > { %s955_s12 = sshll.u32 %s993_s9, 4  ;;  %v267_v19 = vstv %s993_s9 }
  0x7d   : > { %p273_p9 = scmp.lt.s32.totalorder %s955_s12, 0  ;;  %s274_s27 = sadd.s32 256, %s955_s12  ;;  %v268_v20 = vsub.s32 %v2055_v1, %v267_v19 }
  0x7f   : > { %s2484_s27 = smov (!%p273_p9, %s274_s27), %s955_s12  ;;  %vm269_vm0 = vcmp.ge.s32.totalorder %v268_v20, 0  ;;  %vm270_vm1 = vcmp.lt.s32.totalorder %v268_v20, 16 }
  0x80   : > { %s279_s20 = sand.u32 255, %s2484_s27   ;;  %vm271_vm2 = vmand %vm269_vm0, %vm270_vm1 }
  0x81   : > { %s280_s0 = sand.u32 127, %s279_s20   ;;  %s281_s14 = sshrl.u32 %s279_s20, 7  ;;  %v297_v26 = vsel %vm271_vm2, 1, %v1915_v25 }
  0x82   : > { %282 = vrot.lane.b32.xlu0 %v2068_v5, %s280_s0  ;;  %s292_s28 = sand.u32 1, %s281_s14  ;;  %v286_v28 = vstv %s280_s0  ;;  %v301_v31 = vrot.slane %v297_v26, %v300_v23  ;;  %v305_v32 = vrot.slane %v297_v26, %v304_v24 }
  0x83   : > { %v293_v29 = vstv %s292_s28  ;;  %vm289_vm3 = vcmp.lt.s32.totalorder %v288_v27, %v286_v28 }
  0x84   : > { %vm294_vm4 = vcmp.ne.s32.totalorder %v293_v29, 0  ;;  %vm306_vm5 = vcmp.eq.s32.totalorder %v301_v31, 1  ;;  %vm307_vm6 = vcmp.eq.s32.totalorder %v305_v32, 1 }
  0x86   : > { %284 = vrot.lane.b32.xlu0 %v277_v18, %s280_s0 }
  0xf4   : > { %v283_v30 = vpop.permute.xlu0 %282 }
  0xf8   : > { %v285_v33 = vpop.permute.xlu0 %284 }
  0xf9   : > { %v290_v34 = vsel %vm289_vm3, %v283_v30, %v285_v33  ;;  %v291_v35 = vsel %vm289_vm3, %v285_v33, %v283_v30 }
  0xfa   : > { %v295_v36 = vsel %vm294_vm4, %v290_v34, %v291_v35  ;;  %v296_v37 = vsel %vm294_vm4, %v291_v35, %v290_v34 }
  0xfb   : > { %v308_v17 = vsel %vm306_vm5, %v295_v36, 0.0   ;;  %v309_v16 = vsel %vm307_vm6, %v296_v37, 0.0  }
  0xfc PF: > { %314 = sbr.rel (%p2132_p0) target bundleno = 389 (0x185), region = 76  ;;  %p994_p12 = scmp.lt.s32.totalorder (!%p2132_p0), %s2063_s10, 0  ;;  %v325_v38 = vcombine.high (!%p2132_p0), %v2068_v5, %v2068_v5  ;;  %v335_v41 = vlaneseq (!%p2132_p0)  ;;  %v1916_v45 = vmov (!%p2132_p0), 0   ;;  %v1759_v17 = vphi %v1757_v17, %v308_v17   ;;  %v1755_v16 = vphi %v1753_v16, %v309_v16  }
  0xfd   : > { %s995_s0 = sceil.f32 (!%p2132_p0), %s2063_s10  ;;  %s996_s27 = sfloor.f32 (!%p2132_p0), %s2063_s10 }
  0xfe   : > { %v347_v42 = vshrl.u32 (!%p2132_p0), %v335_v41, 7  ;;  %v336_v47 = vand.u32 (!%p2132_p0), 127, %v335_v41 }
 0x100   : > { %v348_v43 = vsub.s32 (!%p2132_p0), 0, %v347_v42  ;;  %v352_v44 = vsub.s32 (!%p2132_p0), 1, %v347_v42 }
 0x103   : > { %s2486_s0 = smov (!%p994_p12, %s995_s0), %s996_s27 }
 0x104   : > { %s998_s20 = scvt.f32.s32 %s2486_s0 }
 0x106   : > { %p321_p1 = scmp.lt.s32.totalorder %s998_s20, 0  ;;  %s322_s5 = sadd.s32 256, %s998_s20  ;;  %v316_v39 = vstv %s998_s20 }
 0x107   : > { %v317_v40 = vsub.s32 %v2046_v0, %v316_v39 }
 0x108   : > { %s2488_s5 = smov (!%p321_p1, %s322_s5), %s998_s20 }
 0x109   : > { %s327_s9 = sand.u32 255, %s2488_s5   ;;  %vm318_vm7 = vcmp.ge.s32.totalorder %v317_v40, 0  ;;  %vm319_vm8 = vcmp.lt.s32.totalorder %v317_v40, 16 }
 0x10a   : > { %s328_s12 = sand.u32 127, %s327_s9   ;;  %s329_s22 = sshrl.u32 %s327_s9, 7  ;;  %vm320_vm9 = vmand %vm318_vm7, %vm319_vm8 }
 0x10b   : > { %330 = vrot.lane.b32.xlu0 %v2068_v5, %s328_s12  ;;  %s340_s14 = sand.u32 1, %s329_s22  ;;  %v345_v46 = vsel %vm320_vm9, 1, %v1916_v45  ;;  %v334_v48 = vstv %s328_s12 }
 0x10c   : > { %v341_v49 = vstv %s340_s14  ;;  %v349_v51 = vrot.slane %v345_v46, %v348_v43  ;;  %v353_v52 = vrot.slane %v345_v46, %v352_v44  ;;  %vm337_vm10 = vcmp.lt.s32.totalorder %v336_v47, %v334_v48 }
 0x10d   : > { %vm342_vm11 = vcmp.ne.s32.totalorder %v341_v49, 0 }
 0x10e   : > { %vm354_vm12 = vcmp.eq.s32.totalorder %v349_v51, 1  ;;  %vm355_vm13 = vcmp.eq.s32.totalorder %v353_v52, 1 }
 0x10f   : > { %332 = vrot.lane.b32.xlu0 %v325_v38, %s328_s12 }
 0x17d   : > { %v331_v50 = vpop.permute.xlu0 %330 }
 0x181   : > { %v333_v53 = vpop.permute.xlu0 %332 }
 0x182   : > { %v338_v54 = vsel %vm337_vm10, %v331_v50, %v333_v53  ;;  %v339_v55 = vsel %vm337_vm10, %v333_v53, %v331_v50 }
 0x183   : > { %v343_v56 = vsel %vm342_vm11, %v338_v54, %v339_v55  ;;  %v344_v57 = vsel %vm342_vm11, %v339_v55, %v338_v54 }
 0x184   : > { %v356_v17 = vsel %vm354_vm12, %v343_v56, 0.0   ;;  %v357_v16 = vsel %vm355_vm13, %v344_v57, 0.0  }
 0x185 PF: > { %v1777_v14 = vmov %v1771_v16   ;;  %v1781_v15 = vmov %v1775_v17   ;;  %364 = sbr.rel (%p2123_p2) target bundleno = 564 (0x234), region = 80  ;;  %v366_v58 = vcombine.high (!%p2123_p2), %v2068_v5, %v2068_v5  ;;  %vm368_vm14 = vcmask (!%p2123_p2), 1043456   ;;  %v1767_v17 = vphi %v1759_v17, %v356_v17   ;;  %v1763_v16 = vphi %v1755_v16, %v357_v16   ;;  %v1775_v17 = vphi %v2129_v17, %v1767_v17   ;;  %v1771_v16 = vphi %v2127_v16, %v1763_v16  }
 0x186   : > { %v369_v59 = vsel (!%p2123_p2), %vm368_vm14, %v2068_v5, inf  ;;  %v374_v61 = vsel (!%p2123_p2), %vm368_vm14, %v2068_v5, -inf  ;;  %v1917_v7 = vmov (!%p2123_p2), 839922192   ;;  %v388_v9 = vlaneseq (!%p2123_p2) }
 0x187   : > { %v370_v60 = vsel (!%p2123_p2), %vm368_vm14, %v366_v58, inf  ;;  %v375_v62 = vsel (!%p2123_p2), %vm368_vm14, %v366_v58, -inf  ;;  %v386_v8 = vunpack.c.l.s4 (!%p2123_p2), %v1917_v7 }
 0x188   : > { %v371_v63 = vmin.f32 (!%p2123_p2), %v369_v59, %v370_v60  ;;  %v376_v2 = vmax.f32 (!%p2123_p2), %v374_v61, %v375_v62  ;;  %v389_v12 = vshrl.u32 (!%p2123_p2), %v388_v9, 7 }
 0x189   : > { %v387_v11 = vunpack.c.0.s8 (!%p2123_p2), %v386_v8 }
 0x18a   : > { %372 = vmin.xlane.f32.xlu0 (!%p2123_p2), %v371_v63 }
 0x18b   : > { %v390_v13 = vsub.s32 (!%p2123_p2), %v387_v11, %v389_v12 }
 0x18e   : > { %377 = vmax.xlane.f32.xlu0 %v376_v2 }
 0x217   : > { %v373_v3 = vpop.xlane.xlu0 %372 }
 0x218   : > { %v391_v14 = vrot.slane %v373_v3, %v390_v13 }
 0x21a   : > { %v393_v17 = vsub.f32 %v2068_v5, %v391_v14 }
 0x21b   : > { %v378_v4 = vpop.xlane.xlu0 %377 }
 0x21c   : > { %v379_v6 = vsub.f32 %v378_v4, %v373_v3  ;;  %vm383_vm15 = vcmp.gt.f32.partialorder %v378_v4, %v373_v3 }
 0x21e   : > { %v380_v10 = vmax.f32 %v379_v6, 1e-06 }
 0x220   : > { %1485 = vrcp.f32 %v380_v10 }
 0x22a   : > { %v1486_v15 = vpop.eup %1485 }
 0x22b   : > { %v382_v16 = vmul.f32 255.0, %v1486_v15 }
 0x22d   : > { %v401_v18 = vrot.slane %v382_v16, %v390_v13 }
 0x22f   : > { %v403_v19 = vmul.f32 %v401_v18, %v393_v17 }
 0x231   : > { %v407_v20 = vcombine.high %v403_v19, %v403_v19  ;;  %v409_v15 = vsel %vm383_vm15, %v403_v19, %v2068_v5  }
 0x233   : > { %v410_v14 = vsel %vm383_vm15, %v407_v20, %v366_v58  }
 0x234 PF: > { %v1793_v12 = vmov %v1787_v14   ;;  %v1797_v13 = vmov %v1791_v15   ;;  %417 = sbr.rel (%p2114_p13) target bundleno = 801 (0x321), region = 84  ;;  %v418_v21 = vmul.f32 (!%p2114_p13), 0.299, %v2068_v5  ;;  %v419_v22 = vmul.f32 (!%p2114_p13), 0.587, %v2068_v5  ;;  %v1783_v15 = vphi %v1781_v15, %v409_v15   ;;  %v1779_v14 = vphi %v1777_v14, %v410_v14   ;;  %v1791_v15 = vphi %v2120_v15, %v1783_v15   ;;  %v1787_v14 = vphi %v2118_v14, %v1779_v14  }
 0x235   : > { %v425_v23 = vmul.f32 (!%p2114_p13), 0.114, %v2068_v5  ;;  %v433_v24 = vlaneseq (!%p2114_p13)  ;;  %vm443_vm0 = vcmask (!%p2114_p13), 1040384   ;;  %v462_v49 = vstv (!%p2114_p13), %s2063_s10 }
 0x236   : > { %v956_v25 = vrot.slane (!%p2114_p13), %v419_v22, 9 }
 0x237   : > { %v957_v26 = vrot.slane (!%p2114_p13), %v425_v23, 10  ;;  %v434_v27 = vshrl.u32 (!%p2114_p13), %v433_v24, 7 }
 0x238   : > { %v424_v28 = vadd.f32 (!%p2114_p13), %v956_v25, %v418_v21 }
 0x239   : > { %v435_v30 = vsub.s32 (!%p2114_p13), 0, %v434_v27  ;;  %v439_v31 = vsub.s32 (!%p2114_p13), 4, %v434_v27 }
 0x23a   : > { %v430_v29 = vadd.f32 (!%p2114_p13), %v957_v26, %v424_v28 }
 0x23c   : > { %v431_v32 = vfloor.f32 %v430_v29 }
 0x23e   : > { %v436_v33 = vrot.slane %v431_v32, %v435_v30  ;;  %v440_v34 = vrot.slane %v431_v32, %v439_v31 }
 0x240   : > { %v444_v35 = vsel %vm443_vm0, %v436_v33, 0.0  ;;  %v445_v36 = vsel %vm443_vm0, %v440_v34, 0.0 }
 0x241   : > { %v446_v37 = vadd.f32 %v445_v36, %v444_v35 }
 0x243   : > { %447 = vadd.xlane.f32.xlu0 %v446_v37 }
 0x2d0   : > { %v448_v38 = vpop.xlane.xlu0 %447 }
 0x2d1   : > { %v449_v39 = vrot.slane %v448_v38, 4 }
 0x2d3   : > { %v450_v40 = vadd.f32 %v449_v39, %v448_v38 }
 0x2d5   : > { %v451_v41 = vrot.slane %v450_v40, 2 }
 0x2d7   : > { %v452_v42 = vadd.f32 %v451_v41, %v450_v40 }
 0x2d9   : > { %v453_v43 = vrot.slane %v452_v42, 1 }
 0x2db   : > { %v454_v44 = vadd.f32 %v453_v43, %v452_v42 }
 0x2dd   : > { %999 = vpush %v454_v44 }
 0x30e   : > { %s1000_s11 = spop %999 }
 0x30f   : > { %v456_v45 = vstv %s1000_s11 }
 0x310   : > { %v458_v46 = vmul.f32 0.00390625, %v456_v45 }
 0x312   : > { %v459_v47 = vadd.f32 0.5, %v458_v46 }
 0x314   : > { %v460_v48 = vfloor.f32 %v459_v47 }
 0x316   : > { %v461_v50 = vsub.f32 %v2068_v5, %v460_v48 }
 0x318   : > { %v463_v51 = vmul.f32 %v462_v49, %v461_v50 }
 0x31a   : > { %v464_v52 = vadd.f32 %v463_v51, %v460_v48 }
 0x31c   : > { %v465_v53 = vmax.f32 %v464_v52, 0.0 }
 0x31e   : > { %v466_v13 = vmin.f32 %v465_v53, 255.0  }
 0x320   : > { %v468_v12 = vcombine.high %v466_v13, %v466_v13  }
 0x321 PF: > { %v477_v54 = vstv %s2063_s10  ;;  %s1026_s13 = scalar_select %p2103_p11, 1, 0  ;;  %v1799_v13 = vphi %v1797_v13, %v466_v13   ;;  %v1795_v12 = vphi %v1793_v12, %v468_v12   ;;  %v1807_v13 = vphi %v2109_v13, %v1799_v13   ;;  %v1803_v12 = vphi %v2107_v12, %v1795_v12  }
 0x322   : > { %v478_v55 = vmul.f32 %v477_v54, %v2068_v5 }
 0x323   : > { %v1027_v56 = vstv %s1026_s13 }
 0x324   : > { %v479_v57 = vmax.f32 %v478_v55, 0.0  ;;  %vm1028_vm1 = vcmp.ne.s32.totalorder %v1027_v56, 0 }
 0x326   : > { %v480_v58 = vmin.f32 %v479_v57, 255.0 }
 0x328   : > { %v482_v59 = vcombine.high %v480_v58, %v480_v58  ;;  %v1029_v11 = vsel %vm1028_vm1, %v480_v58, %v1807_v13  }
 0x32a   : > { %v1033_v10 = vsel %vm1028_vm1, %v482_v59, %v1803_v12  }
 0x32b PF: > { %s1918_s6 = smov 1.0   ;;  %v1815_v11 = vphi %v2098_v11, %v1029_v11   ;;  %v1811_v10 = vphi %v2096_v10, %v1033_v10  }
 0x32c   : > { %s491_s28 = smax.f32 %s1918_s6, %s2063_s10 }
 0x32d   : > { %v492_v60 = vstv %s491_s28  ;;  %s1035_s0 = scalar_select %p2092_p8, 1, 0 }
 0x32e   : > { %1487 = vrcp.f32 %v492_v60 }
 0x32f   : > { %v1036_v63 = vstv %s1035_s0 }
 0x330   : > { %vm1037_vm2 = vcmp.ne.s32.totalorder %v1036_v63, 0 }
 0x338   : > { %v1488_v61 = vpop.eup %1487 }
 0x339   : > { %v494_v62 = vmul.f32 %v1488_v61, %v2068_v5 }
 0x33b   : > { %v495_v2 = vfloor.f32 %v494_v62 }
 0x33d   : > { %v496_v3 = vmul.f32 %v495_v2, %v492_v60 }
 0x33f   : > { %v498_v4 = vcombine.high %v496_v3, %v496_v3  ;;  %v1038_v9 = vsel %vm1037_vm2, %v496_v3, %v1815_v11  }
 0x341   : > { %v1042_v8 = vsel %vm1037_vm2, %v498_v4, %v1811_v10  }
 0x342 PF: > { %v507_v6 = vstv %s2063_s10  ;;  %v509_v7 = vsub.f32 255.0, %v2068_v5  ;;  %s1044_s29 = scalar_select %p2081_p7, 1, 0  ;;  %v1823_v9 = vphi %v2087_v9, %v1038_v9   ;;  %v1819_v8 = vphi %v2085_v8, %v1042_v8  }
 0x343   : > { %vm508_vm3 = vcmp.lt.f32.partialorder %v2068_v5, %v507_v6 }
 0x344   : > { %v510_v10 = vsel %vm508_vm3, %v2068_v5, %v509_v7  ;;  %v1045_v11 = vstv %s1044_s29 }
 0x345   : > { %v512_v12 = vcombine.high %v510_v10, %v510_v10  ;;  %vm1046_vm4 = vcmp.ne.s32.totalorder %v1045_v11, 0 }
 0x346   : > { %v1047_v7 = vsel %vm1046_vm4, %v510_v10, %v1823_v9  }
 0x347   : > { %v1051_v6 = vsel %vm1046_vm4, %v512_v12, %v1819_v8  }
 0x348 PF: > { %v522_v13 = vcombine.high %v2068_v5, %v2068_v5  ;;  %s1053_s10 = scalar_select %p942_p4, 1, 0  ;;  %v2232_v15 = vmov 0   ;;  %v2234_v16 = vmov 0   ;;  %v1831_v7 = vphi %v2076_v7, %v1047_v7   ;;  %v1827_v6 = vphi %v2074_v6, %v1051_v6  }
 0x349   : > { %s526_s23 = sadd.s32 1, %s2058_s7 }
 0x34a   : > { %v1054_v9 = vstv %s1053_s10  ;;  %s527_s27 = sld [smem:[#allocation2 + %s526_s23]] }
 0x34b   : > { %s2222_s20 = sld [smem:[#allocation6 + %s526_s23]]  ;;  %vm1055_vm5 = vcmp.ne.s32.totalorder %v1054_v9, 0 }
 0x34c   : > { %v2225_v8 = vsel %vm1055_vm5, %v2068_v5, %v1831_v7  ;;  %v2227_v14 = vsel %vm1055_vm5, %v522_v13, %v1827_v6 }
 0x350   : > { %p529_p7 = scmp.gt.s32.totalorder %s527_s27, 0  ;;  %p958_p8 = scmp.lt.s32.totalorder %s527_s27, 7 }
 0x352   : > { %s2490_s27 = smov (!%p529_p7, %s527_s27), 0 }
 0x353   : > { %s2492_s27 = smov (!%p958_p8, %s2490_s27), 7 }
 0x354   : > { %p963_p11 = scmp.eq.s32.totalorder %s2492_s27, 0 }
 0x355   : > { %s964_s7 = sadd.s32 (!%p963_p11), 4294967295, %s2492_s27  ;;  %v2243_v5 = vmov (!%p963_p11), 0   ;;  %v2245_v17 = vmov (!%p963_p11), 0  }
 0x356   : > { %536 = sbr.rel (%p963_p11) target bundleno = 1609 (0x649), region = 104  ;;  %p2239_p4 = scmp.eq.s32.totalorder (!%p963_p11), %s964_s7, 0 }
 0x35d   : > { %541 = sbr.rel (%p2239_p4) target bundleno = 1604 (0x644), region = 108  ;;  %s966_s5 = sadd.s32 (!%p2239_p4), 4294967294, %s2492_s27  ;;  %v2254_v18 = vmov (!%p2239_p4), 0   ;;  %v2256_v19 = vmov (!%p2239_p4), 0  }
 0x35e   : > { %p2250_p13 = scmp.eq.s32.totalorder (!%p2239_p4), %s966_s5, 0 }
 0x364   : > { %546 = sbr.rel (%p2250_p13) target bundleno = 1583 (0x62f), region = 112  ;;  %s968_s12 = sadd.s32 (!%p2250_p13), 4294967293, %s2492_s27  ;;  %v2265_v20 = vmov (!%p2250_p13), 0   ;;  %v2267_v21 = vmov (!%p2250_p13), 0  }
 0x365   : > { %p2261_p2 = scmp.eq.s32.totalorder (!%p2250_p13), %s968_s12, 0 }
 0x36b   : > { %551 = sbr.rel (%p2261_p2) target bundleno = 1575 (0x627), region = 116  ;;  %s970_s14 = sadd.s32 (!%p2261_p2), 4294967292, %s2492_s27  ;;  %v2276_v22 = vmov (!%p2261_p2), 0   ;;  %v2278_v23 = vmov (!%p2261_p2), 0  }
 0x36c   : > { %p2272_p3 = scmp.ne.s32.totalorder (!%p2261_p2), %s970_s14, 0  ;;  %p971_p0 = scmp.eq.s32.totalorder (!%p2261_p2), %s970_s14, 0 }
 0x372   : > { %556 = sbr.rel (%p971_p0) target bundleno = 1341 (0x53d), region = 120  ;;  %s972_s13 = sadd.s32 (!%p971_p0), 4294967291, %s2492_s27  ;;  %v2285_v24 = vmov (!%p971_p0), 0   ;;  %v2287_v25 = vmov (!%p971_p0), 0  }
 0x373   : > { %p2281_p10 = scmp.ne.s32.totalorder (!%p971_p0), %s972_s13, 0  ;;  %p973_p6 = scmp.eq.s32.totalorder (!%p971_p0), %s972_s13, 0 }
 0x379   : > { %561 = sbr.rel (%p973_p6) target bundleno = 1171 (0x493), region = 124  ;;  %s974_s28 = sadd.s32 (!%p973_p6), 4294967290, %s2492_s27  ;;  %v1833_v24 = vmov (!%p973_p6), 0   ;;  %v1837_v25 = vmov (!%p973_p6), 0  }
 0x37a   : > { %p2290_p9 = scmp.ne.s32.totalorder (!%p973_p6), %s974_s28, 0  ;;  %p975_p12 = scmp.eq.s32.totalorder (!%p973_p6), %s974_s28, 0 }
 0x380   : > { %566 = sbr.rel (%p975_p12) target bundleno = 1034 (0x40a), region = 128  ;;  %p1001_p1 = scmp.lt.s32.totalorder (!%p975_p12), %s2222_s20, 0  ;;  %v585_v28 = vlaneseq (!%p975_p12)  ;;  %v1919_v32 = vmov (!%p975_p12), 0  }
 0x381   : > { %s1002_s29 = sceil.f32 (!%p975_p12), %s2222_s20  ;;  %s1003_s10 = sfloor.f32 (!%p975_p12), %s2222_s20 }
 0x382   : > { %v597_v29 = vshrl.u32 (!%p975_p12), %v585_v28, 7  ;;  %v586_v34 = vand.u32 (!%p975_p12), 127, %v585_v28 }
 0x384   : > { %v598_v30 = vsub.s32 (!%p975_p12), 0, %v597_v29  ;;  %v602_v31 = vsub.s32 (!%p975_p12), 1, %v597_v29 }
 0x387   : > { %s2494_s29 = smov (!%p1001_p1, %s1002_s29), %s1003_s10 }
 0x388   : > { %s1005_s23 = scvt.f32.s32 %s2494_s29 }
 0x38a   : > { %s976_s7 = sshll.u32 %s1005_s23, 4  ;;  %v568_v26 = vstv %s1005_s23 }
 0x38b   : > { %p574_p7 = scmp.lt.s32.totalorder %s976_s7, 0  ;;  %s575_s5 = sadd.s32 256, %s976_s7  ;;  %v569_v27 = vsub.s32 %v2055_v1, %v568_v26 }
 0x38d   : > { %s2496_s5 = smov (!%p574_p7, %s575_s5), %s976_s7  ;;  %vm570_vm6 = vcmp.ge.s32.totalorder %v569_v27, 0  ;;  %vm571_vm7 = vcmp.lt.s32.totalorder %v569_v27, 16 }
 0x38e   : > { %s577_s12 = sand.u32 255, %s2496_s5   ;;  %vm572_vm8 = vmand %vm570_vm6, %vm571_vm7 }
 0x38f   : > { %s578_s14 = sand.u32 127, %s577_s12   ;;  %s579_s13 = sshrl.u32 %s577_s12, 7  ;;  %v595_v33 = vsel %vm572_vm8, 1, %v1919_v32 }
 0x390   : > { %580 = vrot.lane.b32.xlu0 %v2225_v8, %s578_s14  ;;  %s590_s28 = sand.u32 1, %s579_s13  ;;  %v584_v35 = vstv %s578_s14  ;;  %v599_v38 = vrot.slane %v595_v33, %v598_v30  ;;  %v603_v39 = vrot.slane %v595_v33, %v602_v31 }
 0x391   : > { %v591_v36 = vstv %s590_s28  ;;  %vm587_vm9 = vcmp.lt.s32.totalorder %v586_v34, %v584_v35 }
 0x392   : > { %vm592_vm10 = vcmp.ne.s32.totalorder %v591_v36, 0  ;;  %vm604_vm11 = vcmp.eq.s32.totalorder %v599_v38, 1  ;;  %vm605_vm12 = vcmp.eq.s32.totalorder %v603_v39, 1 }
 0x394   : > { %582 = vrot.lane.b32.xlu0 %v2227_v14, %s578_s14 }
 0x402   : > { %v581_v37 = vpop.permute.xlu0 %580 }
 0x406   : > { %v583_v1 = vpop.permute.xlu0 %582 }
 0x407   : > { %v588_v40 = vsel %vm587_vm9, %v581_v37, %v583_v1  ;;  %v589_v41 = vsel %vm587_vm9, %v583_v1, %v581_v37 }
 0x408   : > { %v593_v42 = vsel %vm592_vm10, %v588_v40, %v589_v41  ;;  %v594_v43 = vsel %vm592_vm10, %v589_v41, %v588_v40 }
 0x409   : > { %v606_v25 = vsel %vm604_vm11, %v593_v42, 0.0   ;;  %v607_v24 = vsel %vm605_vm12, %v594_v43, 0.0  }
 0x40a PF: > { %612 = sbr.rel (%p2290_p9) target bundleno = 1171 (0x493), region = 132  ;;  %p1006_p8 = scmp.lt.s32.totalorder (!%p2290_p9), %s2222_s20, 0  ;;  %v630_v46 = vlaneseq (!%p2290_p9)  ;;  %v1920_v50 = vmov (!%p2290_p9), 0   ;;  %v1839_v25 = vphi %v1837_v25, %v606_v25   ;;  %v1835_v24 = vphi %v1833_v24, %v607_v24  }
 0x40b   : > { %s1007_s29 = sceil.f32 (!%p2290_p9), %s2222_s20  ;;  %s1008_s10 = sfloor.f32 (!%p2290_p9), %s2222_s20 }
 0x40c   : > { %v642_v47 = vshrl.u32 (!%p2290_p9), %v630_v46, 7  ;;  %v631_v52 = vand.u32 (!%p2290_p9), 127, %v630_v46 }
 0x40e   : > { %v643_v48 = vsub.s32 (!%p2290_p9), 0, %v642_v47  ;;  %v647_v49 = vsub.s32 (!%p2290_p9), 1, %v642_v47 }
 0x411   : > { %s2498_s29 = smov (!%p1006_p8, %s1007_s29), %s1008_s10 }
 0x412   : > { %s1010_s23 = scvt.f32.s32 %s2498_s29 }
 0x414   : > { %p619_p0 = scmp.lt.s32.totalorder %s1010_s23, 0  ;;  %s620_s7 = sadd.s32 256, %s1010_s23  ;;  %v614_v44 = vstv %s1010_s23 }
 0x415   : > { %v615_v45 = vsub.s32 %v2046_v0, %v614_v44 }
 0x416   : > { %s2500_s7 = smov (!%p619_p0, %s620_s7), %s1010_s23 }
 0x417   : > { %s622_s5 = sand.u32 255, %s2500_s7   ;;  %vm616_vm13 = vcmp.ge.s32.totalorder %v615_v45, 0  ;;  %vm617_vm14 = vcmp.lt.s32.totalorder %v615_v45, 16 }
 0x418   : > { %s623_s12 = sand.u32 127, %s622_s5   ;;  %s624_s0 = sshrl.u32 %s622_s5, 7  ;;  %vm618_vm15 = vmand %vm616_vm13, %vm617_vm14 }
 0x419   : > { %625 = vrot.lane.b32.xlu0 %v2225_v8, %s623_s12  ;;  %s635_s14 = sand.u32 1, %s624_s0  ;;  %v640_v51 = vsel %vm618_vm15, 1, %v1920_v50  ;;  %v629_v53 = vstv %s623_s12 }
 0x41a   : > { %v636_v54 = vstv %s635_s14  ;;  %v644_v56 = vrot.slane %v640_v51, %v643_v48  ;;  %v648_v57 = vrot.slane %v640_v51, %v647_v49  ;;  %vm632_vm0 = vcmp.lt.s32.totalorder %v631_v52, %v629_v53 }
 0x41b   : > { %vm637_vm1 = vcmp.ne.s32.totalorder %v636_v54, 0 }
 0x41c   : > { %vm649_vm2 = vcmp.eq.s32.totalorder %v644_v56, 1  ;;  %vm650_vm3 = vcmp.eq.s32.totalorder %v648_v57, 1 }
 0x41d   : > { %627 = vrot.lane.b32.xlu0 %v2227_v14, %s623_s12 }
 0x48b   : > { %v626_v55 = vpop.permute.xlu0 %625 }
 0x48f   : > { %v628_v0 = vpop.permute.xlu0 %627 }
 0x490   : > { %v633_v58 = vsel %vm632_vm0, %v626_v55, %v628_v0  ;;  %v634_v59 = vsel %vm632_vm0, %v628_v0, %v626_v55 }
 0x491   : > { %v638_v60 = vsel %vm637_vm1, %v633_v58, %v634_v59  ;;  %v639_v61 = vsel %vm637_vm1, %v634_v59, %v633_v58 }
 0x492   : > { %v651_v25 = vsel %vm649_vm2, %v638_v60, 0.0   ;;  %v652_v24 = vsel %vm650_vm3, %v639_v61, 0.0  }
 0x493 PF: > { %v1857_v22 = vmov %v1851_v24   ;;  %v1861_v23 = vmov %v1855_v25   ;;  %659 = sbr.rel (%p2281_p10) target bundleno = 1341 (0x53d), region = 136  ;;  %vm660_vm4 = vcmask (!%p2281_p10), 1043456   ;;  %v1847_v25 = vphi %v1839_v25, %v651_v25   ;;  %v1843_v24 = vphi %v1835_v24, %v652_v24   ;;  %v1855_v25 = vphi %v2287_v25, %v1847_v25   ;;  %v1851_v24 = vphi %v2285_v24, %v1843_v24  }
 0x494   : > { %v661_v62 = vsel (!%p2281_p10), %vm660_vm4, %v2225_v8, inf  ;;  %v662_v63 = vsel (!%p2281_p10), %vm660_vm4, %v2227_v14, inf  ;;  %v666_v2 = vsel (!%p2281_p10), %vm660_vm4, %v2225_v8, -inf  ;;  %v667_v3 = vsel (!%p2281_p10), %vm660_vm4, %v2227_v14, -inf }
 0x495   : > { %v663_v4 = vmin.f32 (!%p2281_p10), %v661_v62, %v662_v63  ;;  %v668_v6 = vmax.f32 (!%p2281_p10), %v666_v2, %v667_v3 }
 0x497   : > { %664 = vmin.xlane.f32.xlu0 (!%p2281_p10), %v663_v4 }
 0x49b   : > { %669 = vmax.xlane.f32.xlu0 %v668_v6 }
 0x524   : > { %v665_v7 = vpop.xlane.xlu0 %664 }
 0x525   : > { %v676_v9 = vsub.f32 %v2225_v8, %v665_v7  ;;  %v677_v15 = vsub.f32 %v2227_v14, %v665_v7 }
 0x528   : > { %v670_v10 = vpop.xlane.xlu0 %669 }
 0x529   : > { %v671_v11 = vsub.f32 %v670_v10, %v665_v7  ;;  %vm675_vm5 = vcmp.gt.f32.partialorder %v670_v10, %v665_v7 }
 0x52b   : > { %v672_v12 = vmax.f32 %v671_v11, 1e-06 }
 0x52d   : > { %1489 = vrcp.f32 %v672_v12 }
 0x537   : > { %v1490_v13 = vpop.eup %1489 }
 0x538   : > { %v674_v16 = vmul.f32 255.0, %v1490_v13 }
 0x53a   : > { %v678_v5 = vmul.f32 %v676_v9, %v674_v16  ;;  %v679_v17 = vmul.f32 %v677_v15, %v674_v16 }
 0x53c   : > { %v682_v23 = vsel %vm675_vm5, %v678_v5, %v2225_v8   ;;  %v683_v22 = vsel %vm675_vm5, %v679_v17, %v2227_v14  }
 0x53d PF: > { %v1873_v20 = vmov %v1867_v22   ;;  %v1877_v21 = vmov %v1871_v23   ;;  %690 = sbr.rel (%p2272_p3) target bundleno = 1575 (0x627), region = 140  ;;  %v691_v18 = vmul.f32 (!%p2272_p3), 0.299, %v2225_v8  ;;  %v692_v19 = vmul.f32 (!%p2272_p3), 0.299, %v2227_v14  ;;  %v1863_v23 = vphi %v1861_v23, %v682_v23   ;;  %v1859_v22 = vphi %v1857_v22, %v683_v22   ;;  %v1871_v23 = vphi %v2278_v23, %v1863_v23   ;;  %v1867_v22 = vphi %v2276_v22, %v1859_v22  }
 0x53e   : > { %v693_v24 = vmul.f32 (!%p2272_p3), 0.587, %v2225_v8  ;;  %v694_v25 = vmul.f32 (!%p2272_p3), 0.587, %v2227_v14  ;;  %v703_v26 = vmul.f32 (!%p2272_p3), 0.114, %v2225_v8  ;;  %v735_v47 = vstv (!%p2272_p3), %s2222_s20 }
 0x53f   : > { %v704_v27 = vmul.f32 (!%p2272_p3), 0.114, %v2227_v14  ;;  %vm715_vm6 = vcmask (!%p2272_p3), 1040384  }
 0x540   : > { %v697_v28 = vrot.slane (!%p2272_p3), %v693_v24, 1  ;;  %v698_v29 = vrot.slane (!%p2272_p3), %v694_v25, 1  ;;  %v707_v30 = vrot.slane (!%p2272_p3), %v703_v26, 2 }
 0x541   : > { %v708_v22 = vrot.slane (!%p2272_p3), %v704_v27, 2 }
 0x542   : > { %v701_v31 = vadd.f32 (!%p2272_p3), %v697_v28, %v691_v18  ;;  %v702_v23 = vadd.f32 (!%p2272_p3), %v698_v29, %v692_v19 }
 0x544   : > { %v711_v32 = vadd.f32 %v707_v30, %v701_v31  ;;  %v712_v33 = vadd.f32 %v708_v22, %v702_v23 }
 0x546   : > { %v713_v20 = vfloor.f32 %v711_v32  ;;  %v714_v21 = vfloor.f32 %v712_v33 }
 0x548   : > { %v716_v34 = vsel %vm715_vm6, %v713_v20, 0.0  ;;  %v717_v35 = vsel %vm715_vm6, %v714_v21, 0.0 }
 0x549   : > { %v718_v36 = vadd.f32 %v717_v35, %v716_v34 }
 0x54b   : > { %719 = vadd.xlane.f32.xlu0 %v718_v36 }
 0x5d8   : > { %v720_v37 = vpop.xlane.xlu0 %719 }
 0x5d9   : > { %v721_v38 = vrot.slane %v720_v37, 4 }
 0x5db   : > { %v722_v39 = vadd.f32 %v721_v38, %v720_v37 }
 0x5dd   : > { %v723_v1 = vrot.slane %v722_v39, 2 }
 0x5df   : > { %v724_v40 = vadd.f32 %v723_v1, %v722_v39 }
 0x5e1   : > { %v725_v41 = vrot.slane %v724_v40, 1 }
 0x5e3   : > { %v726_v42 = vadd.f32 %v725_v41, %v724_v40 }
 0x5e5   : > { %1011 = vpush %v726_v42 }
 0x616   : > { %s1012_s11 = spop %1011 }
 0x617   : > { %v728_v43 = vstv %s1012_s11 }
 0x618   : > { %v730_v44 = vmul.f32 0.00390625, %v728_v43 }
 0x61a   : > { %v731_v45 = vadd.f32 0.5, %v730_v44 }
 0x61c   : > { %v732_v46 = vfloor.f32 %v731_v45 }
 0x61e   : > { %v733_v48 = vsub.f32 %v2225_v8, %v732_v46  ;;  %v734_v49 = vsub.f32 %v2227_v14, %v732_v46 }
 0x620   : > { %v736_v50 = vmul.f32 %v735_v47, %v733_v48  ;;  %v737_v51 = vmul.f32 %v735_v47, %v734_v49 }
 0x622   : > { %v738_v52 = vadd.f32 %v736_v50, %v732_v46  ;;  %v739_v53 = vadd.f32 %v737_v51, %v732_v46 }
 0x624   : > { %v740_v54 = vmax.f32 %v738_v52, 0.0  ;;  %v741_v55 = vmax.f32 %v739_v53, 0.0 }
 0x626   : > { %v742_v21 = vmin.f32 %v740_v54, 255.0   ;;  %v743_v20 = vmin.f32 %v741_v55, 255.0  }
 0x627 PF: > { %v751_v56 = vstv %s2222_s20  ;;  %s1062_s6 = scalar_select %p2261_p2, 1, 0  ;;  %v1879_v21 = vphi %v1877_v21, %v742_v21   ;;  %v1875_v20 = vphi %v1873_v20, %v743_v20   ;;  %v1887_v21 = vphi %v2267_v21, %v1879_v21   ;;  %v1883_v20 = vphi %v2265_v20, %v1875_v20  }
 0x628   : > { %v752_v57 = vmul.f32 %v2225_v8, %v751_v56  ;;  %v753_v0 = vmul.f32 %v2227_v14, %v751_v56 }
 0x629   : > { %v1063_v58 = vstv %s1062_s6 }
 0x62a   : > { %v754_v59 = vmax.f32 %v752_v57, 0.0  ;;  %v755_v60 = vmax.f32 %v753_v0, 0.0  ;;  %vm1064_vm7 = vcmp.ne.s32.totalorder %v1063_v58, 0 }
 0x62c   : > { %v756_v61 = vmin.f32 %v754_v59, 255.0  ;;  %v757_v62 = vmin.f32 %v755_v60, 255.0 }
 0x62e   : > { %v1065_v19 = vsel %vm1064_vm7, %v756_v61, %v1887_v21   ;;  %v1069_v18 = vsel %vm1064_vm7, %v757_v62, %v1883_v20  }
 0x62f PF: > { %s1921_s22 = smov 1.0   ;;  %v1895_v19 = vphi %v2256_v19, %v1065_v19   ;;  %v1891_v18 = vphi %v2254_v18, %v1069_v18  }
 0x630   : > { %s765_s13 = smax.f32 %s1921_s22, %s2222_s20 }
 0x631   : > { %v766_v63 = vstv %s765_s13  ;;  %s1071_s28 = scalar_select %p2250_p13, 1, 0 }
 0x632   : > { %1491 = vrcp.f32 %v766_v63 }
 0x633   : > { %v1072_v6 = vstv %s1071_s28 }
 0x634   : > { %vm1073_vm8 = vcmp.ne.s32.totalorder %v1072_v6, 0 }
 0x63c   : > { %v1492_v2 = vpop.eup %1491 }
 0x63d   : > { %v768_v3 = vmul.f32 %v1492_v2, %v2225_v8  ;;  %v769_v4 = vmul.f32 %v1492_v2, %v2227_v14 }
 0x63f   : > { %v770_v7 = vfloor.f32 %v768_v3  ;;  %v771_v10 = vfloor.f32 %v769_v4 }
 0x641   : > { %v772_v11 = vmul.f32 %v770_v7, %v766_v63  ;;  %v773_v12 = vmul.f32 %v771_v10, %v766_v63 }
 0x643   : > { %v1074_v17 = vsel %vm1073_vm8, %v772_v11, %v1895_v19   ;;  %v1078_v5 = vsel %vm1073_vm8, %v773_v12, %v1891_v18  }
 0x644 PF: > { %v781_v13 = vstv %s2222_s20  ;;  %v784_v9 = vsub.f32 255.0, %v2225_v8  ;;  %v785_v15 = vsub.f32 255.0, %v2227_v14  ;;  %s1080_s9 = scalar_select %p2239_p4, 1, 0  ;;  %v1903_v17 = vphi %v2245_v17, %v1074_v17   ;;  %v1899_v5 = vphi %v2243_v5, %v1078_v5  }
 0x645   : > { %vm782_vm9 = vcmp.lt.f32.partialorder %v2225_v8, %v781_v13  ;;  %vm783_vm10 = vcmp.lt.f32.partialorder %v2227_v14, %v781_v13 }
 0x646   : > { %v786_v16 = vsel %vm782_vm9, %v2225_v8, %v784_v9  ;;  %v787_v18 = vsel %vm783_vm10, %v2227_v14, %v785_v15  ;;  %v1081_v19 = vstv %s1080_s9 }
 0x647   : > { %vm1082_vm11 = vcmp.ne.s32.totalorder %v1081_v19, 0 }
 0x648   : > { %v1083_v16 = vsel %vm1082_vm11, %v786_v16, %v1903_v17   ;;  %v1087_v15 = vsel %vm1082_vm11, %v787_v18, %v1899_v5  }
 0x649 PF: > { %s1089_s20 = scalar_select %p963_p11, 1, 0  ;;  %v1922_v22 = vmov 1966171168   ;;  %v815_v23 = vlaneseq  ;;  %v1911_v16 = vphi %v2234_v16, %v1083_v16   ;;  %v1907_v15 = vphi %v2232_v15, %v1087_v15  }
 0x64a   : > { %v813_v31 = vunpack.c.l.s4 %v1922_v22  ;;  %s988_s27 = sshll.u32 %s1970_s19, 5  ;;  %s2469_s8 = scalar_lea.vmem [#allocation7], %s2050_s30 }
 0x64b   : > { %v1090_v24 = vstv %s1089_s20  ;;  %v816_v34 = vshrl.u32 %v815_v23, 7  ;;  %s842_s29 = sshll.u32 %s2469_s8, 4  ;;  %s2394_s7 = scalar_lea.hbm %s2444_s4, %s988_s27  ;;  %s2396_s29 = int_to_ptr.vmem [resolvable:$true] %s842_s29 }
 0x64c   : > { %vm1091_vm12 = vcmp.ne.s32.totalorder %v1090_v24, 0  ;;  %s2470_s5 = smov %s2469_s8  ;;  %s2471_s12 = sand.u32 1, %s1743_s16  }
 0x64d   : > { %v1092_v25 = vsel %vm1091_vm12, %v2225_v8, %v1911_v16  ;;  %v1096_v17 = vsel %vm1091_vm12, %v2227_v14, %v1907_v15  ;;  %v814_v8 = vunpack.c.0.s8 %v813_v31  ;;  %s828_s0 = scalar_lea.sflag [#allocation3], %s2471_s12  ;;  %s1521_s14 = scalar_lea.vmem %s2396_s29, 32 }
 0x64e   : > { %v797_v5 = vmax.f32 %v1092_v25, 0.0  ;;  %v798_v26 = vmax.f32 %v1096_v17, 0.0  ;;  %p1522_p11 = scmp.ne.s32.totalorder %s2396_s29, %s1521_s14  ;;  %s1923_s19 = smov [#allocation7]  }
 0x64f   : > { %v817_v38 = vsub.s32 %v814_v8, %v816_v34  ;;  %s1525_s11 = sshll.u32 %s1923_s19, 4  ;;  %s1526_s11 = int_to_ptr.vmem [resolvable:$false] %s1525_s11 }
 0x650   : > { %v799_v27 = vmin.f32 %v797_v5, 255.0  ;;  %v800_v28 = vmin.f32 %v798_v26, 255.0  ;;  %p1523_p4 = pnand %p1522_p11, %p1987_p5  ;;  %s1527_s6 = scalar_lea.vmem %s1526_s11, 64 }
 0x651   : > { %p1528_p2 = scmp.lt.s32.totalorder %s2396_s29, %s1526_s11  ;;  %p1529_p3 = scmp.lt.s32.totalorder %s1527_s6, %s1521_s14 }
 0x652   : > { %v801_v29 = vadd.f32 0.5, %v799_v27  ;;  %v802_v30 = vadd.f32 0.5, %v800_v28  ;;  %p1524_p13 = pneg %p1523_p4 }
 0x653   : > { %p1530_p10 = por %p1529_p3, %p1528_p2 }
 0x654   : > { %v803_v32 = vfloor.f32 %v801_v29  ;;  %v804_v33 = vfloor.f32 %v802_v30 }
 0x655   : > { %p1531_p6 = pnand %p1530_p10, %p1524_p13 }
 0x656   : > { %v1013_v20 = vtrunc.f32 %v803_v32  ;;  %v1015_v21 = vtrunc.f32 %v804_v33 }
 0x658   : > { %v1014_v14 = vcvt.f32.s32 %v1013_v20  ;;  %v1016_v35 = vcvt.f32.s32 %v1015_v21 }
 0x65a   : > { %v807_v36 = vpack.c.b16 %v1014_v14, %v1014_v14  ;;  %v809_v37 = vpack.c.b16 %v1016_v35, %v1016_v35 }
 0x65c   : > { %v977_v39 = vpack.c.b8 %v809_v37, %v807_v36 }
 0x65e   : > { %v818_v1 = vrot.slane %v977_v39, %v817_v38 }
 0x660   : > { %978 = vst.sshfl [vmem:[%s2470_s5] sm:$0x5 pattern:$0x73625140] %v818_v1 }
 0x661   : > { %1534 = shalt.err (!%p1531_p6)
}
 0x662   : > { %s1535_s30 = scalar_lea.hbm %s2394_s7, 32  ;;  %s1539_s28 = scalar_lea.hbm %s2444_s4, 64 }
 0x663   : > { %p1536_p9 = scmp.ne.s32.totalorder %s2394_s7, %s1535_s30  ;;  %p1540_p7 = scmp.lt.u32.totalorder %s2394_s7, %s2444_s4 }
 0x664   : > { %p1541_p8 = scmp.lt.u32.totalorder %s1539_s28, %s1535_s30  ;;  %p1543_p11 = scmp.lt.u32.totalorder %s1535_s30, %s2394_s7 }
 0x665   : > { %p1537_p12 = pnand %p1536_p9, %p1987_p5 }
 0x666   : > { %p1542_p0 = por %p1541_p8, %p1540_p7 }
 0x667   : > { %p1538_p1 = pneg %p1537_p12 }
 0x668   : > { %p1544_p4 = por %p1543_p11, %p1542_p0 }
 0x66a   : > { %p1545_p13 = pnand %p1544_p4, %p1538_p1 }
 0x66c   : > { %1548 = shalt.err (!%p1545_p13)
}
 0x66d   : > { %1097 = dma.vmem_to_hbm [thread:$0]  (%p1987_p5), %s2396_s29, 32, %s2394_s7, %s828_s0  }
 0x66e PF: > { %p1122_p2 = scmp.ge.s32.totalorder %s1751_s18, 2  ;;  %s854_s27 = sand.u32 1, %s1739_s15  }
 0x66f   : > { %p2472_p3 = scmp.ne.s32.totalorder %s2449_s26, 0  ;;  %s855_s8 = scalar_lea.sflag [#allocation3], %s854_s27 }
 0x671   : > { %p1107_p10 = pnand %p1122_p2, %p2472_p3 }
 0x673   : > { %1734 = dma.done.wait (!%p1107_p10), %s855_s8, 32  }
 0x674   : > { %1736 = vsyncadd (!%p1107_p10), %s855_s8, 4294967264  ;;  %p16_p6 = scmp.ge.s32.totalorder %s1974_s21, 4   ;;  %s2473_s15 = smov %s1743_s16 }
 0x675   : > { %s2474_s16 = smov %s1747_s17  ;;  %s2475_s17 = smov %s1985_s24 }
 0x676   : > { %s2476_s18 = smov %s1974_s21  ;;  %18 = sbr.rel (!%p16_p6) target bundleno = 7 (0x7), region = 194 }
 0x67d   :  { %860 = vsyncpa [#allocation3], 1 }
 0x67e   :  { %862 = vsyncpa [#allocation3 + $0x1], 1 }
 0x67f   :  { %863 = vsyncpa [#allocation4], 1 }
 0x680   :  { %865 = vsyncpa [#allocation4 + $0x1], 1 }
 0x681   :  { %866 = vsyncpa [#allocation5], 1 }
 0x682   :  { %868 = vsyncpa [#allocation5 + $0x1], 1 }

</bundles_post_ra>
